<compile_context>
chip_gen: v7x
topology: tpu7x:2x2x1
jax: 0.10.0
libtpu: 0.0.40
codegen_flags: <defaults>
</compile_context>

<pallas_src>
import functools
import math

import jax
import jax.numpy as jnp
from jax import lax
from jax.experimental import pallas as pl
from jax.experimental.pallas import tpu as pltpu

EPS = 1e-5


def _rmsnorm(h, g):
    # f32 throughout (matches RMSNorm._norm on x.float())
    ms = jnp.mean(h * h, axis=-1, keepdims=True)
    return h * jax.lax.rsqrt(ms + EPS) * g


def _gelu(x):
    c = jnp.sqrt(jnp.float32(2.0 / math.pi))
    return 0.5 * x * (1.0 + jnp.tanh(c * (x + 0.44715 * x * x * x)))


def transformer_block_kernel(x_ref, g1_ref, wqkv_ref, wo_ref, bo_ref,
                             g2_ref, w1_ref, b1_ref, w2_ref, b2_ref, o_ref,
                             *, num_heads, q_tile, compute_dtype):
    T, D = x_ref.shape                       # batch dim squeezed by BlockSpec
    H = num_heads
    hd = D // H
    cd = compute_dtype
    tq = q_tile
    full_tile = (tq == T)                    # static

    g1 = g1_ref[...]                         # (1, D) f32

    x_full = x_ref[...].astype(jnp.float32)  # (T, D)
    h_full = _rmsnorm(x_full, g1)            # f32
    hm = h_full.astype(cd)                   # matmul operand dtype

    if full_tile:
        x_q = x_full
        hm_q = hm
    else:
        q0 = pl.multiple_of(pl.program_id(1) * tq, tq)
        x_q = x_ref[pl.ds(q0, tq), :].astype(jnp.float32)       # (tq, D)
        hm_q = _rmsnorm(x_q, g1).astype(cd)                     # rows of hm (recomputed, cheap)

    scale = 1.0 / jnp.sqrt(jnp.float32(hd))
    acc = jnp.zeros((tq, D), jnp.float32)    # fused out-projection accumulator

    # TODO(synk): at large H, fold the head loop into a grid axis / fori_loop to
    # bound live ranges; for moderate H a fully unrolled loop schedules best.
    for head in range(H):
        w_h = wqkv_ref[head]                 # (D, 3*hd), already compute_dtype
        if full_tile:
            qkv = jnp.dot(hm, w_h, preferred_element_type=jnp.float32)   # (T, 3hd), N=3hd
            q = qkv[:, :hd]
            k = qkv[:, hd:2 * hd]
            v = qkv[:, 2 * hd:]
        else:
            q = jnp.dot(hm_q, w_h[:, :hd], preferred_element_type=jnp.float32)   # (tq, hd)
            kv = jnp.dot(hm, w_h[:, hd:], preferred_element_type=jnp.float32)    # (T, 2hd)
            k = kv[:, :hd]
            v = kv[:, hd:]
        q = q.astype(cd)
        k = k.astype(cd)
        v = v.astype(cd)

        # scores (tq, T); causal mask intentionally NOT applied
        # (the module's masked_fill result is discarded).
        s = lax.dot_general(q, k, (((1,), (1,)), ((), ())),
                            preferred_element_type=jnp.float32) * scale
        m = jnp.max(s, axis=-1, keepdims=True)
        p = jnp.exp(s - m)                                   # f32
        l = jnp.sum(p, axis=-1, keepdims=True)

        ctx = jnp.dot(p.astype(cd), v, preferred_element_type=jnp.float32)   # (tq, hd)
        # deferred softmax normalization: scale the small (tq, hd) tensor, not (tq, T)
        ctx = ctx * pl.reciprocal(l, approx=False)   # approx=True in production (EUP slot)

        # fused output projection: accumulate directly into (tq, D), N = D full width
        acc = acc + jnp.dot(ctx.astype(cd), wo_ref[head],
                            preferred_element_type=jnp.float32)

    attn = acc + bo_ref[...]                 # (tq, D) f32

    # drop_shortcut: nn.Dropout -> identity in eval mode.
    x1 = attn + x_q

    # ---- RMSNorm 2 + Feedforward (weights already compute_dtype) ----
    h2 = _rmsnorm(x1, g2_ref[...])
    ff1 = jnp.dot(h2.astype(cd), w1_ref[...],
                  preferred_element_type=jnp.float32) + b1_ref[...]
    ff1 = _gelu(ff1)                         # f32 tanh path (v5e has no bf16 EUP)
    ff2 = jnp.dot(ff1.astype(cd), w2_ref[...],
                  preferred_element_type=jnp.float32) + b2_ref[...]

    o_ref[...] = (ff2 + x1).astype(o_ref.dtype)


def transformer_block(x, params, num_heads, compute_dtype=jnp.float32, q_tile=None):
    g1, wq, wk, wv, wo, bo, g2, w1, b1, w2, b2 = params
    B, T, D = x.shape
    H = num_heads
    hd = D // H
    H4 = w1.shape[1]
    cd = compute_dtype

    if q_tile is None:
        q_tile = T
        if T > 512:
            for cand in (512, 256, 128):
                if T % cand == 0:
                    q_tile = cand
                    break
    assert T % q_tile == 0
    nq = T // q_tile

    # ---- host-side weight prep (done once by XLA, outside the kernel) ----
    # head-split + Q/K/V fusion: (H, D, 3*hd), cast matmul weights to compute dtype
    wq_h = wq.reshape(D, H, hd).transpose(1, 0, 2)
    wk_h = wk.reshape(D, H, hd).transpose(1, 0, 2)
    wv_h = wv.reshape(D, H, hd).transpose(1, 0, 2)
    wqkv_h = jnp.concatenate([wq_h, wk_h, wv_h], axis=-1).astype(cd)   # (H, D, 3hd)
    wo_h = wo.reshape(H, hd, D).astype(cd)                             # (H, hd, D)
    w1_c = w1.astype(cd)
    w2_c = w2.astype(cd)
    # norm weights / biases stay f32 (added/applied in the f32 paths)

    def rep(shape):
        # grid-invariant block: DMA'd once, resident in VMEM for all grid steps
        return pl.BlockSpec(shape, lambda b, qi: (0,) * len(shape))

    kernel = functools.partial(transformer_block_kernel,
                               num_heads=H, q_tile=q_tile, compute_dtype=cd)

    # advisory cost estimate (per review): QKV + scores + PV + out-proj + FF
    flops = int(B * (24 * T * D * D + 4 * T * T * D))
    transcendentals = int(B * (H * T * T + 8 * T * D))
    wbytes = int((wqkv_h.size + wo_h.size + w1_c.size + w2_c.size)
                 * jnp.dtype(cd).itemsize)
    sbytes = int((g1.size + g2.size + bo.size + b1.size + b2.size) * 4)
    bytes_accessed = int(2 * x.size * x.dtype.itemsize + wbytes + sbytes)

    return pl.pallas_call(
        kernel,
        out_shape=jax.ShapeDtypeStruct((B, T, D), x.dtype),
        grid=(B, nq),
        in_specs=[
            pl.BlockSpec((None, T, D), lambda b, qi: (b, 0, 0)),  # x (full seq, batch squeezed)
            rep((1, D)),                                          # norm1 weight
            rep((H, D, 3 * hd)),                                  # fused Wqkv (head-split)
            rep((H, hd, D)), rep((1, D)),                         # Wo (head-split), bo
            rep((1, D)),                                          # norm2 weight
            rep((D, H4)), rep((1, H4)),                           # W1, b1
            rep((H4, D)), rep((1, D)),                            # W2, b2
        ],
        out_specs=pl.BlockSpec((None, q_tile, D), lambda b, qi: (b, qi, 0)),
        compiler_params=pltpu.CompilerParams(
            dimension_semantics=("parallel", "parallel"),
            vmem_limit_bytes=64 * 1024 * 1024),   # tune per generation (v7x: leave headroom)
        cost_estimate=pl.CostEstimate(flops=flops,
                                      transcendentals=transcendentals,
                                      bytes_accessed=bytes_accessed),
    )(x, g1, wqkv_h, wo_h, bo, g2, w1_c, b1, w2_c, b2)


def reference_block(x, params, num_heads):
    """Pure-JAX reference reproducing the PyTorch forward exactly (f32)."""
    g1, wq, wk, wv, wo, bo, g2, w1, b1, w2, b2 = params
    B, T, D = x.shape
    hd = D // num_heads

    def rms(h, g):
        return h * jax.lax.rsqrt(jnp.mean(h * h, -1, keepdims=True) + EPS) * g

    h = rms(x, g1)
    q = (h @ wq).reshape(B, T, num_heads, hd).transpose(0, 2, 1, 3)
    k = (h @ wk).reshape(B, T, num_heads, hd).transpose(0, 2, 1, 3)
    v = (h @ wv).reshape(B, T, num_heads, hd).transpose(0, 2, 1, 3)
    s = jnp.einsum('bhqd,bhkd->bhqk', q, k) / jnp.sqrt(jnp.float32(hd))
    # mask intentionally not applied (matches the module's non-in-place masked_fill)
    p = jax.nn.softmax(s, axis=-1)
    ctx = jnp.einsum('bhqk,bhkd->bhqd', p, v).transpose(0, 2, 1, 3).reshape(B, T, D)
    x1 = ctx @ wo + bo + x
    h2 = rms(x1, g2)
    ff1 = _gelu(h2 @ w1 + b1)
    return ff1 @ w2 + b2 + x1


if __name__ == "__main__":
    B, T, D, H = 2, 8, 32, 4   # emb_dim=32, context_length=8, n_heads=4
    key = jax.random.PRNGKey(0)
    ks = jax.random.split(key, 10)

    x = jax.random.normal(ks[0], (B, T, D), jnp.float32)

    def w(k, shape, scale=0.05):
        return scale * jax.random.normal(k, shape, jnp.float32)

    params = (
        jnp.ones((1, D), jnp.float32),                          # norm1 weight
        w(ks[1], (D, D)), w(ks[2], (D, D)), w(ks[3], (D, D)),   # Wq, Wk, Wv
        w(ks[4], (D, D)), w(ks[5], (1, D)),                     # Wo, bo
        jnp.ones((1, D), jnp.float32),                          # norm2 weight
        w(ks[6], (D, 4 * D)), w(ks[7], (1, 4 * D)),             # W1, b1
        w(ks[8], (4 * D, D)), w(ks[9], (1, D)),                 # W2, b2
    )

    ref = jax.block_until_ready(reference_block(x, params, num_heads=H))

    # f32 path: strict parity with the PyTorch-equivalent reference
    out = jax.block_until_ready(transformer_block(x, params, num_heads=H))
    assert out.shape == (B, T, D)
    assert jnp.allclose(out, ref, rtol=1e-3, atol=1e-3), "f32 kernel mismatch vs reference"

    # bf16-MXU-operand path (bf16 weights at the call boundary, f32 accumulation,
    # f32 norm/softmax/GELU): looser tolerance
    out_bf16 = jax.block_until_ready(
        transformer_block(x, params, num_heads=H, compute_dtype=jnp.bfloat16))
    assert jnp.allclose(out_bf16, ref, rtol=5e-2, atol=5e-2), "bf16 kernel drift too large"

    print("KERNEL_OK")
</pallas_src>

<mosaic_0001>
module attributes {stable_mosaic.version = 11 : i64} {
  func.func @transformer_block_kernel(%arg0: i32, %arg1: i32, %arg2: memref<1x8x32xf32, #tpu.memory_space<vmem>>, %arg3: memref<1x32xf32, #tpu.memory_space<vmem>>, %arg4: memref<4x32x24xf32, #tpu.memory_space<vmem>>, %arg5: memref<4x8x32xf32, #tpu.memory_space<vmem>>, %arg6: memref<1x32xf32, #tpu.memory_space<vmem>>, %arg7: memref<1x32xf32, #tpu.memory_space<vmem>>, %arg8: memref<32x128xf32, #tpu.memory_space<vmem>>, %arg9: memref<1x128xf32, #tpu.memory_space<vmem>>, %arg10: memref<128x32xf32, #tpu.memory_space<vmem>>, %arg11: memref<1x32xf32, #tpu.memory_space<vmem>>, %arg12: memref<1x8x32xf32, #tpu.memory_space<vmem>>) attributes {dimension_semantics = [#tpu.dimension_semantics<parallel>, #tpu.dimension_semantics<parallel>], iteration_bounds = array<i64: 2, 1>, scalar_prefetch = 0 : i64, scratch_operands = 0 : i64, tpu.core_type = #tpu.core_type<tc>, window_params = [{transform_indices = @transform_0, window_bounds = array<i64: 1, 8, 32>}, {pipeline_mode = #tpu.pipeline_mode<synchronous>, transform_indices = @transform_1, window_bounds = array<i64: 1, 32>}, {pipeline_mode = #tpu.pipeline_mode<synchronous>, transform_indices = @transform_2, window_bounds = array<i64: 4, 32, 24>}, {pipeline_mode = #tpu.pipeline_mode<synchronous>, transform_indices = @transform_3, window_bounds = array<i64: 4, 8, 32>}, {pipeline_mode = #tpu.pipeline_mode<synchronous>, transform_indices = @transform_4, window_bounds = array<i64: 1, 32>}, {pipeline_mode = #tpu.pipeline_mode<synchronous>, transform_indices = @transform_5, window_bounds = array<i64: 1, 32>}, {pipeline_mode = #tpu.pipeline_mode<synchronous>, transform_indices = @transform_6, window_bounds = array<i64: 32, 128>}, {pipeline_mode = #tpu.pipeline_mode<synchronous>, transform_indices = @transform_7, window_bounds = array<i64: 1, 128>}, {pipeline_mode = #tpu.pipeline_mode<synchronous>, transform_indices = @transform_8, window_bounds = array<i64: 128, 32>}, {pipeline_mode = #tpu.pipeline_mode<synchronous>, transform_indices = @transform_9, window_bounds = array<i64: 1, 32>}, {transform_indices = @transform_10, window_bounds = array<i64: 1, 8, 32>}]} {
    %c0 = arith.constant 0 : index
    %c0_0 = arith.constant 0 : index
    %0 = vector.load %arg3[%c0, %c0_0] : memref<1x32xf32, #tpu.memory_space<vmem>>, vector<1x32xf32>
    %c0_1 = arith.constant 0 : index
    %c0_2 = arith.constant 0 : index
    %c0_3 = arith.constant 0 : index
    %1 = vector.load %arg2[%c0_1, %c0_2, %c0_3] : memref<1x8x32xf32, #tpu.memory_space<vmem>>, vector<1x8x32xf32>
    %2 = vector.shape_cast %1 : vector<1x8x32xf32> to vector<8x32xf32>
    %3 = arith.mulf %2, %2 : vector<8x32xf32>
    %cst = arith.constant dense<0.000000e+00> : vector<8xf32>
    %4 = vector.multi_reduction <add>, %3, %cst [1] : vector<8x32xf32> to vector<8xf32>
    %5 = vector.shape_cast %4 : vector<8xf32> to vector<8x1xf32>
    %cst_4 = arith.constant 3.200000e+01 : f32
    %6 = vector.broadcast %cst_4 : f32 to vector<8x1xf32>
    %7 = arith.divf %5, %6 : vector<8x1xf32>
    %cst_5 = arith.constant 9.99999974E-6 : f32
    %8 = vector.broadcast %cst_5 : f32 to vector<8x1xf32>
    %9 = arith.addf %7, %8 : vector<8x1xf32>
    %10 = math.rsqrt %9 : vector<8x1xf32>
    %11 = vector.broadcast %10 : vector<8x1xf32> to vector<8x32xf32>
    %12 = arith.mulf %2, %11 : vector<8x32xf32>
    %13 = vector.broadcast %0 : vector<1x32xf32> to vector<8x32xf32>
    %14 = arith.mulf %12, %13 : vector<8x32xf32>
    %cst_6 = arith.constant 8.000000e+00 : f32
    %15 = math.sqrt %cst_6 : f32
    %cst_7 = arith.constant 1.000000e+00 : f32
    %16 = arith.divf %cst_7, %15 : f32
    %cst_8 = arith.constant 0.000000e+00 : f32
    %17 = vector.broadcast %cst_8 : f32 to vector<8x32xf32>
    %c0_9 = arith.constant 0 : index
    %c0_10 = arith.constant 0 : index
    %c0_11 = arith.constant 0 : index
    %18 = vector.load %arg4[%c0_9, %c0_10, %c0_11] : memref<4x32x24xf32, #tpu.memory_space<vmem>>, vector<1x32x24xf32>
    %19 = vector.shape_cast %18 : vector<1x32x24xf32> to vector<32x24xf32>
    %cst_12 = arith.constant dense<0.000000e+00> : vector<8x24xf32>
    %20 = tpu.matmul %14, %19, %cst_12 {dimension_numbers = #tpu.dot_dimension_numbers<[1], [0], [0], [1], [0, 0, 1, 1], [], []>} : vector<8x32xf32>, vector<32x24xf32>, vector<8x24xf32> -> vector<8x24xf32>
    %21 = vector.extract_strided_slice %20 {offsets = [0, 0], sizes = [8, 8], strides = [1, 1]} : vector<8x24xf32> to vector<8x8xf32>
    %22 = vector.extract_strided_slice %20 {offsets = [0, 8], sizes = [8, 8], strides = [1, 1]} : vector<8x24xf32> to vector<8x8xf32>
    %23 = vector.extract_strided_slice %20 {offsets = [0, 16], sizes = [8, 8], strides = [1, 1]} : vector<8x24xf32> to vector<8x8xf32>
    %cst_13 = arith.constant dense<0.000000e+00> : vector<8x8xf32>
    %24 = tpu.matmul %21, %22, %cst_13 {dimension_numbers = #tpu.dot_dimension_numbers<[1], [1], [0], [0], [0, 0, 1, 0], [], []>} : vector<8x8xf32>, vector<8x8xf32>, vector<8x8xf32> -> vector<8x8xf32>
    %25 = vector.broadcast %16 : f32 to vector<8x8xf32>
    %26 = arith.mulf %24, %25 : vector<8x8xf32>
    %cst_14 = arith.constant dense<0xFF800000> : vector<8xf32>
    %27 = vector.multi_reduction <maximumf>, %26, %cst_14 [1] : vector<8x8xf32> to vector<8xf32>
    %28 = vector.shape_cast %27 : vector<8xf32> to vector<8x1xf32>
    %29 = vector.broadcast %28 : vector<8x1xf32> to vector<8x8xf32>
    %30 = arith.subf %26, %29 : vector<8x8xf32>
    %31 = math.exp %30 : vector<8x8xf32>
    %cst_15 = arith.constant dense<0.000000e+00> : vector<8xf32>
    %32 = vector.multi_reduction <add>, %31, %cst_15 [1] : vector<8x8xf32> to vector<8xf32>
    %33 = vector.shape_cast %32 : vector<8xf32> to vector<8x1xf32>
    %cst_16 = arith.constant dense<0.000000e+00> : vector<8x8xf32>
    %34 = tpu.matmul %31, %23, %cst_16 {dimension_numbers = #tpu.dot_dimension_numbers<[1], [0], [0], [1], [0, 0, 1, 1], [], []>} : vector<8x8xf32>, vector<8x8xf32>, vector<8x8xf32> -> vector<8x8xf32>
    %35 = tpu.reciprocal %33 : vector<8x1xf32> -> vector<8x1xf32>
    %36 = vector.broadcast %35 : vector<8x1xf32> to vector<8x8xf32>
    %37 = arith.mulf %34, %36 : vector<8x8xf32>
    %c0_17 = arith.constant 0 : index
    %c0_18 = arith.constant 0 : index
    %c0_19 = arith.constant 0 : index
    %38 = vector.load %arg5[%c0_17, %c0_18, %c0_19] : memref<4x8x32xf32, #tpu.memory_space<vmem>>, vector<1x8x32xf32>
    %39 = vector.shape_cast %38 : vector<1x8x32xf32> to vector<8x32xf32>
    %cst_20 = arith.constant dense<0.000000e+00> : vector<8x32xf32>
    %40 = tpu.matmul %37, %39, %cst_20 {dimension_numbers = #tpu.dot_dimension_numbers<[1], [0], [0], [1], [0, 0, 1, 1], [], []>} : vector<8x8xf32>, vector<8x32xf32>, vector<8x32xf32> -> vector<8x32xf32>
    %41 = arith.addf %17, %40 : vector<8x32xf32>
    %c1 = arith.constant 1 : index
    %c0_21 = arith.constant 0 : index
    %c0_22 = arith.constant 0 : index
    %42 = vector.load %arg4[%c1, %c0_21, %c0_22] : memref<4x32x24xf32, #tpu.memory_space<vmem>>, vector<1x32x24xf32>
    %43 = vector.shape_cast %42 : vector<1x32x24xf32> to vector<32x24xf32>
    %cst_23 = arith.constant dense<0.000000e+00> : vector<8x24xf32>
    %44 = tpu.matmul %14, %43, %cst_23 {dimension_numbers = #tpu.dot_dimension_numbers<[1], [0], [0], [1], [0, 0, 1, 1], [], []>} : vector<8x32xf32>, vector<32x24xf32>, vector<8x24xf32> -> vector<8x24xf32>
    %45 = vector.extract_strided_slice %44 {offsets = [0, 0], sizes = [8, 8], strides = [1, 1]} : vector<8x24xf32> to vector<8x8xf32>
    %46 = vector.extract_strided_slice %44 {offsets = [0, 8], sizes = [8, 8], strides = [1, 1]} : vector<8x24xf32> to vector<8x8xf32>
    %47 = vector.extract_strided_slice %44 {offsets = [0, 16], sizes = [8, 8], strides = [1, 1]} : vector<8x24xf32> to vector<8x8xf32>
    %cst_24 = arith.constant dense<0.000000e+00> : vector<8x8xf32>
    %48 = tpu.matmul %45, %46, %cst_24 {dimension_numbers = #tpu.dot_dimension_numbers<[1], [1], [0], [0], [0, 0, 1, 0], [], []>} : vector<8x8xf32>, vector<8x8xf32>, vector<8x8xf32> -> vector<8x8xf32>
    %49 = vector.broadcast %16 : f32 to vector<8x8xf32>
    %50 = arith.mulf %48, %49 : vector<8x8xf32>
    %cst_25 = arith.constant dense<0xFF800000> : vector<8xf32>
    %51 = vector.multi_reduction <maximumf>, %50, %cst_25 [1] : vector<8x8xf32> to vector<8xf32>
    %52 = vector.shape_cast %51 : vector<8xf32> to vector<8x1xf32>
    %53 = vector.broadcast %52 : vector<8x1xf32> to vector<8x8xf32>
    %54 = arith.subf %50, %53 : vector<8x8xf32>
    %55 = math.exp %54 : vector<8x8xf32>
    %cst_26 = arith.constant dense<0.000000e+00> : vector<8xf32>
    %56 = vector.multi_reduction <add>, %55, %cst_26 [1] : vector<8x8xf32> to vector<8xf32>
    %57 = vector.shape_cast %56 : vector<8xf32> to vector<8x1xf32>
    %cst_27 = arith.constant dense<0.000000e+00> : vector<8x8xf32>
    %58 = tpu.matmul %55, %47, %cst_27 {dimension_numbers = #tpu.dot_dimension_numbers<[1], [0], [0], [1], [0, 0, 1, 1], [], []>} : vector<8x8xf32>, vector<8x8xf32>, vector<8x8xf32> -> vector<8x8xf32>
    %59 = tpu.reciprocal %57 : vector<8x1xf32> -> vector<8x1xf32>
    %60 = vector.broadcast %59 : vector<8x1xf32> to vector<8x8xf32>
    %61 = arith.mulf %58, %60 : vector<8x8xf32>
    %c1_28 = arith.constant 1 : index
    %c0_29 = arith.constant 0 : index
    %c0_30 = arith.constant 0 : index
    %62 = vector.load %arg5[%c1_28, %c0_29, %c0_30] : memref<4x8x32xf32, #tpu.memory_space<vmem>>, vector<1x8x32xf32>
    %63 = vector.shape_cast %62 : vector<1x8x32xf32> to vector<8x32xf32>
    %cst_31 = arith.constant dense<0.000000e+00> : vector<8x32xf32>
    %64 = tpu.matmul %61, %63, %cst_31 {dimension_numbers = #tpu.dot_dimension_numbers<[1], [0], [0], [1], [0, 0, 1, 1], [], []>} : vector<8x8xf32>, vector<8x32xf32>, vector<8x32xf32> -> vector<8x32xf32>
    %65 = arith.addf %41, %64 : vector<8x32xf32>
    %c2 = arith.constant 2 : index
    %c0_32 = arith.constant 0 : index
    %c0_33 = arith.constant 0 : index
    %66 = vector.load %arg4[%c2, %c0_32, %c0_33] : memref<4x32x24xf32, #tpu.memory_space<vmem>>, vector<1x32x24xf32>
    %67 = vector.shape_cast %66 : vector<1x32x24xf32> to vector<32x24xf32>
    %cst_34 = arith.constant dense<0.000000e+00> : vector<8x24xf32>
    %68 = tpu.matmul %14, %67, %cst_34 {dimension_numbers = #tpu.dot_dimension_numbers<[1], [0], [0], [1], [0, 0, 1, 1], [], []>} : vector<8x32xf32>, vector<32x24xf32>, vector<8x24xf32> -> vector<8x24xf32>
    %69 = vector.extract_strided_slice %68 {offsets = [0, 0], sizes = [8, 8], strides = [1, 1]} : vector<8x24xf32> to vector<8x8xf32>
    %70 = vector.extract_strided_slice %68 {offsets = [0, 8], sizes = [8, 8], strides = [1, 1]} : vector<8x24xf32> to vector<8x8xf32>
    %71 = vector.extract_strided_slice %68 {offsets = [0, 16], sizes = [8, 8], strides = [1, 1]} : vector<8x24xf32> to vector<8x8xf32>
    %cst_35 = arith.constant dense<0.000000e+00> : vector<8x8xf32>
    %72 = tpu.matmul %69, %70, %cst_35 {dimension_numbers = #tpu.dot_dimension_numbers<[1], [1], [0], [0], [0, 0, 1, 0], [], []>} : vector<8x8xf32>, vector<8x8xf32>, vector<8x8xf32> -> vector<8x8xf32>
    %73 = vector.broadcast %16 : f32 to vector<8x8xf32>
    %74 = arith.mulf %72, %73 : vector<8x8xf32>
    %cst_36 = arith.constant dense<0xFF800000> : vector<8xf32>
    %75 = vector.multi_reduction <maximumf>, %74, %cst_36 [1] : vector<8x8xf32> to vector<8xf32>
    %76 = vector.shape_cast %75 : vector<8xf32> to vector<8x1xf32>
    %77 = vector.broadcast %76 : vector<8x1xf32> to vector<8x8xf32>
    %78 = arith.subf %74, %77 : vector<8x8xf32>
    %79 = math.exp %78 : vector<8x8xf32>
    %cst_37 = arith.constant dense<0.000000e+00> : vector<8xf32>
    %80 = vector.multi_reduction <add>, %79, %cst_37 [1] : vector<8x8xf32> to vector<8xf32>
    %81 = vector.shape_cast %80 : vector<8xf32> to vector<8x1xf32>
    %cst_38 = arith.constant dense<0.000000e+00> : vector<8x8xf32>
    %82 = tpu.matmul %79, %71, %cst_38 {dimension_numbers = #tpu.dot_dimension_numbers<[1], [0], [0], [1], [0, 0, 1, 1], [], []>} : vector<8x8xf32>, vector<8x8xf32>, vector<8x8xf32> -> vector<8x8xf32>
    %83 = tpu.reciprocal %81 : vector<8x1xf32> -> vector<8x1xf32>
    %84 = vector.broadcast %83 : vector<8x1xf32> to vector<8x8xf32>
    %85 = arith.mulf %82, %84 : vector<8x8xf32>
    %c2_39 = arith.constant 2 : index
    %c0_40 = arith.constant 0 : index
    %c0_41 = arith.constant 0 : index
    %86 = vector.load %arg5[%c2_39, %c0_40, %c0_41] : memref<4x8x32xf32, #tpu.memory_space<vmem>>, vector<1x8x32xf32>
    %87 = vector.shape_cast %86 : vector<1x8x32xf32> to vector<8x32xf32>
    %cst_42 = arith.constant dense<0.000000e+00> : vector<8x32xf32>
    %88 = tpu.matmul %85, %87, %cst_42 {dimension_numbers = #tpu.dot_dimension_numbers<[1], [0], [0], [1], [0, 0, 1, 1], [], []>} : vector<8x8xf32>, vector<8x32xf32>, vector<8x32xf32> -> vector<8x32xf32>
    %89 = arith.addf %65, %88 : vector<8x32xf32>
    %c3 = arith.constant 3 : index
    %c0_43 = arith.constant 0 : index
    %c0_44 = arith.constant 0 : index
    %90 = vector.load %arg4[%c3, %c0_43, %c0_44] : memref<4x32x24xf32, #tpu.memory_space<vmem>>, vector<1x32x24xf32>
    %91 = vector.shape_cast %90 : vector<1x32x24xf32> to vector<32x24xf32>
    %cst_45 = arith.constant dense<0.000000e+00> : vector<8x24xf32>
    %92 = tpu.matmul %14, %91, %cst_45 {dimension_numbers = #tpu.dot_dimension_numbers<[1], [0], [0], [1], [0, 0, 1, 1], [], []>} : vector<8x32xf32>, vector<32x24xf32>, vector<8x24xf32> -> vector<8x24xf32>
    %93 = vector.extract_strided_slice %92 {offsets = [0, 0], sizes = [8, 8], strides = [1, 1]} : vector<8x24xf32> to vector<8x8xf32>
    %94 = vector.extract_strided_slice %92 {offsets = [0, 8], sizes = [8, 8], strides = [1, 1]} : vector<8x24xf32> to vector<8x8xf32>
    %95 = vector.extract_strided_slice %92 {offsets = [0, 16], sizes = [8, 8], strides = [1, 1]} : vector<8x24xf32> to vector<8x8xf32>
    %cst_46 = arith.constant dense<0.000000e+00> : vector<8x8xf32>
    %96 = tpu.matmul %93, %94, %cst_46 {dimension_numbers = #tpu.dot_dimension_numbers<[1], [1], [0], [0], [0, 0, 1, 0], [], []>} : vector<8x8xf32>, vector<8x8xf32>, vector<8x8xf32> -> vector<8x8xf32>
    %97 = vector.broadcast %16 : f32 to vector<8x8xf32>
    %98 = arith.mulf %96, %97 : vector<8x8xf32>
    %cst_47 = arith.constant dense<0xFF800000> : vector<8xf32>
    %99 = vector.multi_reduction <maximumf>, %98, %cst_47 [1] : vector<8x8xf32> to vector<8xf32>
    %100 = vector.shape_cast %99 : vector<8xf32> to vector<8x1xf32>
    %101 = vector.broadcast %100 : vector<8x1xf32> to vector<8x8xf32>
    %102 = arith.subf %98, %101 : vector<8x8xf32>
    %103 = math.exp %102 : vector<8x8xf32>
    %cst_48 = arith.constant dense<0.000000e+00> : vector<8xf32>
    %104 = vector.multi_reduction <add>, %103, %cst_48 [1] : vector<8x8xf32> to vector<8xf32>
    %105 = vector.shape_cast %104 : vector<8xf32> to vector<8x1xf32>
    %cst_49 = arith.constant dense<0.000000e+00> : vector<8x8xf32>
    %106 = tpu.matmul %103, %95, %cst_49 {dimension_numbers = #tpu.dot_dimension_numbers<[1], [0], [0], [1], [0, 0, 1, 1], [], []>} : vector<8x8xf32>, vector<8x8xf32>, vector<8x8xf32> -> vector<8x8xf32>
    %107 = tpu.reciprocal %105 : vector<8x1xf32> -> vector<8x1xf32>
    %108 = vector.broadcast %107 : vector<8x1xf32> to vector<8x8xf32>
    %109 = arith.mulf %106, %108 : vector<8x8xf32>
    %c3_50 = arith.constant 3 : index
    %c0_51 = arith.constant 0 : index
    %c0_52 = arith.constant 0 : index
    %110 = vector.load %arg5[%c3_50, %c0_51, %c0_52] : memref<4x8x32xf32, #tpu.memory_space<vmem>>, vector<1x8x32xf32>
    %111 = vector.shape_cast %110 : vector<1x8x32xf32> to vector<8x32xf32>
    %cst_53 = arith.constant dense<0.000000e+00> : vector<8x32xf32>
    %112 = tpu.matmul %109, %111, %cst_53 {dimension_numbers = #tpu.dot_dimension_numbers<[1], [0], [0], [1], [0, 0, 1, 1], [], []>} : vector<8x8xf32>, vector<8x32xf32>, vector<8x32xf32> -> vector<8x32xf32>
    %113 = arith.addf %89, %112 : vector<8x32xf32>
    %c0_54 = arith.constant 0 : index
    %c0_55 = arith.constant 0 : index
    %114 = vector.load %arg6[%c0_54, %c0_55] : memref<1x32xf32, #tpu.memory_space<vmem>>, vector<1x32xf32>
    %115 = vector.broadcast %114 : vector<1x32xf32> to vector<8x32xf32>
    %116 = arith.addf %113, %115 : vector<8x32xf32>
    %117 = arith.addf %116, %2 : vector<8x32xf32>
    %c0_56 = arith.constant 0 : index
    %c0_57 = arith.constant 0 : index
    %118 = vector.load %arg7[%c0_56, %c0_57] : memref<1x32xf32, #tpu.memory_space<vmem>>, vector<1x32xf32>
    %119 = arith.mulf %117, %117 : vector<8x32xf32>
    %cst_58 = arith.constant dense<0.000000e+00> : vector<8xf32>
    %120 = vector.multi_reduction <add>, %119, %cst_58 [1] : vector<8x32xf32> to vector<8xf32>
    %121 = vector.shape_cast %120 : vector<8xf32> to vector<8x1xf32>
    %cst_59 = arith.constant 3.200000e+01 : f32
    %122 = vector.broadcast %cst_59 : f32 to vector<8x1xf32>
    %123 = arith.divf %121, %122 : vector<8x1xf32>
    %cst_60 = arith.constant 9.99999974E-6 : f32
    %124 = vector.broadcast %cst_60 : f32 to vector<8x1xf32>
    %125 = arith.addf %123, %124 : vector<8x1xf32>
    %126 = math.rsqrt %125 : vector<8x1xf32>
    %127 = vector.broadcast %126 : vector<8x1xf32> to vector<8x32xf32>
    %128 = arith.mulf %117, %127 : vector<8x32xf32>
    %129 = vector.broadcast %118 : vector<1x32xf32> to vector<8x32xf32>
    %130 = arith.mulf %128, %129 : vector<8x32xf32>
    %c0_61 = arith.constant 0 : index
    %c0_62 = arith.constant 0 : index
    %131 = vector.load %arg8[%c0_61, %c0_62] : memref<32x128xf32, #tpu.memory_space<vmem>>, vector<32x128xf32>
    %cst_63 = arith.constant dense<0.000000e+00> : vector<8x128xf32>
    %132 = tpu.matmul %130, %131, %cst_63 {dimension_numbers = #tpu.dot_dimension_numbers<[1], [0], [0], [1], [0, 0, 1, 1], [], []>} : vector<8x32xf32>, vector<32x128xf32>, vector<8x128xf32> -> vector<8x128xf32>
    %c0_64 = arith.constant 0 : index
    %c0_65 = arith.constant 0 : index
    %133 = vector.load %arg9[%c0_64, %c0_65] : memref<1x128xf32, #tpu.memory_space<vmem>>, vector<1x128xf32>
    %134 = vector.broadcast %133 : vector<1x128xf32> to vector<8x128xf32>
    %135 = arith.addf %132, %134 : vector<8x128xf32>
    %cst_66 = arith.constant 0.636619746 : f32
    %136 = math.sqrt %cst_66 : f32
    %cst_67 = arith.constant 5.000000e-01 : f32
    %137 = vector.broadcast %cst_67 : f32 to vector<8x128xf32>
    %138 = arith.mulf %137, %135 : vector<8x128xf32>
    %cst_68 = arith.constant 4.471500e-01 : f32
    %139 = vector.broadcast %cst_68 : f32 to vector<8x128xf32>
    %140 = arith.mulf %139, %135 : vector<8x128xf32>
    %141 = arith.mulf %140, %135 : vector<8x128xf32>
    %142 = arith.mulf %141, %135 : vector<8x128xf32>
    %143 = arith.addf %135, %142 : vector<8x128xf32>
    %144 = vector.broadcast %136 : f32 to vector<8x128xf32>
    %145 = arith.mulf %144, %143 : vector<8x128xf32>
    %146 = math.tanh %145 : vector<8x128xf32>
    %cst_69 = arith.constant 1.000000e+00 : f32
    %147 = vector.broadcast %cst_69 : f32 to vector<8x128xf32>
    %148 = arith.addf %147, %146 : vector<8x128xf32>
    %149 = arith.mulf %138, %148 : vector<8x128xf32>
    %c0_70 = arith.constant 0 : index
    %c0_71 = arith.constant 0 : index
    %150 = vector.load %arg10[%c0_70, %c0_71] : memref<128x32xf32, #tpu.memory_space<vmem>>, vector<128x32xf32>
    %cst_72 = arith.constant dense<0.000000e+00> : vector<8x32xf32>
    %151 = tpu.matmul %149, %150, %cst_72 {dimension_numbers = #tpu.dot_dimension_numbers<[1], [0], [0], [1], [0, 0, 1, 1], [], []>} : vector<8x128xf32>, vector<128x32xf32>, vector<8x32xf32> -> vector<8x32xf32>
    %c0_73 = arith.constant 0 : index
    %c0_74 = arith.constant 0 : index
    %152 = vector.load %arg11[%c0_73, %c0_74] : memref<1x32xf32, #tpu.memory_space<vmem>>, vector<1x32xf32>
    %153 = vector.broadcast %152 : vector<1x32xf32> to vector<8x32xf32>
    %154 = arith.addf %151, %153 : vector<8x32xf32>
    %155 = arith.addf %154, %117 : vector<8x32xf32>
    %c0_75 = arith.constant 0 : index
    %c0_76 = arith.constant 0 : index
    %c0_77 = arith.constant 0 : index
    %156 = vector.load %arg12[%c0_75, %c0_76, %c0_77] : memref<1x8x32xf32, #tpu.memory_space<vmem>>, vector<1x8x32xf32>
    %157 = vector.shape_cast %156 : vector<1x8x32xf32> to vector<8x32xf32>
    %158 = vector.shape_cast %155 : vector<8x32xf32> to vector<1x8x32xf32>
    tpu.vector_store %arg12[%c0_75, %c0_76, %c0_77], %158 {strides = array<i32>} : memref<1x8x32xf32, #tpu.memory_space<vmem>>, vector<1x8x32xf32>,
    return
  }
  func.func @transform_0(%arg0: i32, %arg1: i32) -> (i32, i32, i32) {
    %c0_i32 = arith.constant 0 : i32
    %c0_i32_0 = arith.constant 0 : i32
    %c0_i32_1 = arith.constant 0 : i32
    return %arg0, %c0_i32, %c0_i32_0 : i32, i32, i32
  }
  func.func @transform_1(%arg0: i32, %arg1: i32) -> (i32, i32) {
    %c0_i32 = arith.constant 0 : i32
    %c0_i32_0 = arith.constant 0 : i32
    %c0_i32_1 = arith.constant 0 : i32
    return %c0_i32, %c0_i32_0 : i32, i32
  }
  func.func @transform_2(%arg0: i32, %arg1: i32) -> (i32, i32, i32) {
    %c0_i32 = arith.constant 0 : i32
    %c0_i32_0 = arith.constant 0 : i32
    %c0_i32_1 = arith.constant 0 : i32
    %c0_i32_2 = arith.constant 0 : i32
    return %c0_i32, %c0_i32_0, %c0_i32_1 : i32, i32, i32
  }
  func.func @transform_3(%arg0: i32, %arg1: i32) -> (i32, i32, i32) {
    %c0_i32 = arith.constant 0 : i32
    %c0_i32_0 = arith.constant 0 : i32
    %c0_i32_1 = arith.constant 0 : i32
    %c0_i32_2 = arith.constant 0 : i32
    return %c0_i32, %c0_i32_0, %c0_i32_1 : i32, i32, i32
  }
  func.func @transform_4(%arg0: i32, %arg1: i32) -> (i32, i32) {
    %c0_i32 = arith.constant 0 : i32
    %c0_i32_0 = arith.constant 0 : i32
    %c0_i32_1 = arith.constant 0 : i32
    return %c0_i32, %c0_i32_0 : i32, i32
  }
  func.func @transform_5(%arg0: i32, %arg1: i32) -> (i32, i32) {
    %c0_i32 = arith.constant 0 : i32
    %c0_i32_0 = arith.constant 0 : i32
    %c0_i32_1 = arith.constant 0 : i32
    return %c0_i32, %c0_i32_0 : i32, i32
  }
  func.func @transform_6(%arg0: i32, %arg1: i32) -> (i32, i32) {
    %c0_i32 = arith.constant 0 : i32
    %c0_i32_0 = arith.constant 0 : i32
    %c0_i32_1 = arith.constant 0 : i32
    return %c0_i32, %c0_i32_0 : i32, i32
  }
  func.func @transform_7(%arg0: i32, %arg1: i32) -> (i32, i32) {
    %c0_i32 = arith.constant 0 : i32
    %c0_i32_0 = arith.constant 0 : i32
    %c0_i32_1 = arith.constant 0 : i32
    return %c0_i32, %c0_i32_0 : i32, i32
  }
  func.func @transform_8(%arg0: i32, %arg1: i32) -> (i32, i32) {
    %c0_i32 = arith.constant 0 : i32
    %c0_i32_0 = arith.constant 0 : i32
    %c0_i32_1 = arith.constant 0 : i32
    return %c0_i32, %c0_i32_0 : i32, i32
  }
  func.func @transform_9(%arg0: i32, %arg1: i32) -> (i32, i32) {
    %c0_i32 = arith.constant 0 : i32
    %c0_i32_0 = arith.constant 0 : i32
    %c0_i32_1 = arith.constant 0 : i32
    return %c0_i32, %c0_i32_0 : i32, i32
  }
  func.func @transform_10(%arg0: i32, %arg1: i32) -> (i32, i32, i32) {
    %c0_i32 = arith.constant 0 : i32
    %c0_i32_0 = arith.constant 0 : i32
    return %arg0, %arg1, %c0_i32 : i32, i32, i32
  }
}

</mosaic_0001>

<bundles_post_ra>
// kernel: tpu_custom_call.1
= control target key start
LH: loop header
LB: loop body
LE: loop exit
PB: predicated region body
PF: predicated region fallthrough
CT: control target
= control target key end

     0   :  { %s3684_s0 = inlined_call_operand.hbm [shape: f32[2,8,32], index: 0, kind: input, shape index: {}]   ;;  %s3685_s1 = inlined_call_operand.hbm [shape: f32[1,32], index: 1, kind: input, shape index: {}]   ;;  %s3686_s2 = inlined_call_operand.hbm [shape: f32[4,32,24], index: 2, kind: input, shape index: {}]   ;;  %s3687_s3 = inlined_call_operand.hbm [shape: f32[4,8,32], index: 3, kind: input, shape index: {}]   ;;  %s3688_s4 = inlined_call_operand.hbm [shape: f32[1,32], index: 4, kind: input, shape index: {}]   ;;  %s3689_s5 = inlined_call_operand.hbm [shape: f32[1,32], index: 5, kind: input, shape index: {}]   ;;  %s3690_s6 = inlined_call_operand.hbm [shape: f32[32,128], index: 6, kind: input, shape index: {}]   ;;  %s3691_s7 = inlined_call_operand.hbm [shape: f32[1,128], index: 7, kind: input, shape index: {}]   ;;  %s3692_s8 = inlined_call_operand.hbm [shape: f32[128,32], index: 8, kind: input, shape index: {}]   ;;  %s3693_s9 = inlined_call_operand.hbm [shape: f32[1,32], index: 9, kind: input, shape index: {}]   ;;  %s3694_s10 = inlined_call_operand.hbm [shape: f32[2,8,32], index: 10, kind: output, shape index: {}]  }
   0x1   :  { %3705 = sst [smem:[#allocation28_spill]] %s3685_s1 }
   0x2   :  { %3706 = sst [smem:[#allocation29_spill]] %s3687_s3 }
   0x3   :  { %3707 = sst [smem:[#allocation30_spill]] %s3689_s5 }
   0x4   :  { %3708 = sst [smem:[#allocation31_spill]] %s3694_s10 }
   0x5   :  { %15 = vsyncpa [#allocation3], 0 }
   0x6   :  { %17 = vsyncpa [#allocation3 + $0x1], 0 }
   0x7   :  { %18 = vsyncpa [#allocation6], 0 }
   0x8   :  { %19 = vsyncpa [#allocation9], 0 }
   0x9   :  { %20 = vsyncpa [#allocation12], 0 }
   0xa   :  { %21 = vsyncpa [#allocation15], 0 }
   0xb   :  { %22 = vsyncpa [#allocation18], 0 }
   0xc   :  { %23 = vsyncpa [#allocation4], 0 }
   0xd   :  { %25 = vsyncpa [#allocation4 + $0x1], 0  ;;  %s3154_s13 = smov 0   ;;  %s3156_s14 = smov 0  }
   0xe   :  { %s3158_s15 = smov 0   ;;  %s3160_s16 = smov 0  }
   0xf   :  { %s3162_s17 = smov 0   ;;  %s3164_s18 = smov 0  }
  0x10 LB: > { %3709 = sst [smem:[#allocation27_spill]] %s3071_s16  ;;  %s3695_s19 = sadd.s32 4294967295, %s3079_s18   ;;  %s3079_s18 = sphi %s3164_s18, %s31_s18   ;;  %s3075_s17 = sphi %s3162_s17, %s3737_s17   ;;  %s3071_s16 = sphi %s3160_s16, %s3736_s16   ;;  %s3067_s15 = sphi %s3158_s15, %s3735_s15   ;;  %s3063_s14 = sphi %s3156_s14, %s3734_s14   ;;  %s3059_s13 = sphi %s3154_s13, %s3733_s13  }
  0x11   : > { %p2188_p0 = scmp.ge.s32.totalorder %s3079_s18, 1  ;;  %p3188_p1 = scmp.eq.s32.totalorder %s3695_s19, 0 }
  0x12   : > { %p291_p2 = scmp.lt.s32.totalorder %s3079_s18, 3  ;;  %s3081_s22 = smov [#allocation5]  }
  0x13   : > { %s3710_s20 = scalar_select %p3188_p1, 1, 0 }
  0x14   : > { %p3193_p3 = pnand %p2188_p0, %p291_p2  ;;  %s304_s23 = sshll.u32 %s3081_s22, 4  ;;  %s305_s23 = int_to_ptr.vmem [resolvable:$true] %s304_s23 }
  0x15   : > { %s3082_s25 = smov [#allocation8]   ;;  %s3083_s27 = smov [#allocation11]  }
  0x16   : > { %s3711_s21 = scalar_select %p3193_p3, 1, 0 }
  0x17   : > { %p2553_p5 = pneg %p3193_p3  ;;  %s327_s26 = sshll.u32 %s3082_s25, 4  ;;  %s3206_s26 = int_to_ptr.vmem [resolvable:$true] %s327_s26 }
  0x18   : > { %s3208_s28 = sshll.u32 %s3083_s27, 4  ;;  %s3713_s1 = sld [smem:[#allocation28_spill]]  ;;  %s353_s28 = int_to_ptr.vmem [resolvable:$true] %s3208_s28 }
  0x19   : > { %p3202_p6 = pnand %p2553_p5, %p3188_p1 }
  0x1b   : > { %p3218_p8 = pneg %p3202_p6 }
  0x1e   : > { %s2695_s11 = scalar_lea.hbm %s3713_s1, 16 }
  0x1f   : > { %p2696_p7 = scmp.ne.s32.totalorder %s3713_s1, %s2695_s11  ;;  %p2702_p11 = scmp.lt.u32.totalorder %s2695_s11, %s3713_s1 }
  0x21   : > { %p2698_p9 = pnand %p3218_p8, %p2696_p7 }
  0x23   : > { %p2699_p10 = pneg %p2698_p9 }
  0x25   : > { %p2704_p12 = pnand %p2702_p11, %p2699_p10 }
  0x27   : > { %2707 = shalt.err (!%p2704_p12)
}
  0x28   : > { %s2708_s29 = scalar_lea.vmem %s305_s23, 16  ;;  %s2715_s30 = scalar_lea.vmem %s305_s23, 32 }
  0x29   : > { %p2709_p13 = scmp.ne.s32.totalorder %s305_s23, %s2708_s29  ;;  %p2716_p5 = scmp.lt.s32.totalorder %s305_s23, %s305_s23 }
  0x2a   : > { %p2717_p4 = scmp.lt.s32.totalorder %s2715_s30, %s2708_s29 }
  0x2b   : > { %p2711_p0 = pnand %p2709_p13, %p3218_p8 }
  0x2c   : > { %p2718_p3 = por %p2717_p4, %p2716_p5 }
  0x2d   : > { %p2712_p2 = pneg %p2711_p0 }
  0x2f   : > { %p2719_p1 = pnand %p2718_p3, %p2712_p2 }
  0x31   : > { %2722 = shalt.err (!%p2719_p1)
}
  0x32   : > { %2556 = dma.hbm_to_vmem [thread:$0]  (!%p3202_p6), %s3713_s1, 16, %s305_s23, [#allocation6]  }
  0x33   : > { %s3715_s3 = sld [smem:[#allocation29_spill]] }
  0x39   : > { %s2723_s27 = scalar_lea.hbm %s3715_s3, 512 }
  0x3a   : > { %p2724_p7 = scmp.ne.s32.totalorder %s3715_s3, %s2723_s27  ;;  %p2730_p1 = scmp.lt.u32.totalorder %s2723_s27, %s3715_s3 }
  0x3c   : > { %p2726_p9 = pnand %p2724_p7, %p3218_p8 }
  0x3e   : > { %p2727_p4 = pneg %p2726_p9 }
  0x40   : > { %p2732_p3 = pnand %p2730_p1, %p2727_p4 }
  0x42   : > { %2735 = shalt.err (!%p2732_p3)
}
  0x43   : > { %s2736_s23 = scalar_lea.vmem %s3206_s26, 512  ;;  %p2744_p13 = scmp.lt.s32.totalorder %s3206_s26, %s3206_s26 }
  0x44   : > { %p2737_p10 = scmp.ne.s32.totalorder %s3206_s26, %s2736_s23  ;;  %p2745_p0 = scmp.lt.s32.totalorder %s2736_s23, %s2736_s23 }
  0x46   : > { %p2739_p11 = pnand %p2737_p10, %p3218_p8  ;;  %p2746_p2 = por %p2745_p0, %p2744_p13 }
  0x48   : > { %p2740_p12 = pneg %p2739_p11 }
  0x4a   : > { %p2747_p5 = pnand %p2746_p2, %p2740_p12 }
  0x4c   : > { %2750 = shalt.err (!%p2747_p5)
}
  0x4d   : > { %s3700_s10 = smov 128   ;;  %s3702_s16 = smov 8  }
  0x4e   : > { %2562 = dma.hbm_to_vmem [thread:$0]  (!%p3202_p6), %s3715_s3, 512, %s3206_s26, [#allocation9], %s3700_s10, %s3700_s10, %s3702_s16  }
  0x4f   : > { %s3716_s5 = sld [smem:[#allocation30_spill]] }
  0x55   : > { %s2751_s27 = scalar_lea.hbm %s3716_s5, 16 }
  0x56   : > { %p2752_p7 = scmp.ne.s32.totalorder %s3716_s5, %s2751_s27  ;;  %p2758_p1 = scmp.lt.u32.totalorder %s2751_s27, %s3716_s5 }
  0x58   : > { %p2754_p9 = pnand %p2752_p7, %p3218_p8 }
  0x5a   : > { %p2755_p4 = pneg %p2754_p9 }
  0x5c   : > { %p2760_p3 = pnand %p2758_p1, %p2755_p4 }
  0x5e   : > { %2763 = shalt.err (!%p2760_p3)
}
  0x5f   : > { %s2764_s12 = scalar_lea.vmem %s353_s28, 16  ;;  %s2771_s26 = scalar_lea.vmem %s353_s28, 32 }
  0x60   : > { %p2765_p10 = scmp.ne.s32.totalorder %s353_s28, %s2764_s12  ;;  %p2772_p13 = scmp.lt.s32.totalorder %s353_s28, %s353_s28 }
  0x61   : > { %p2773_p0 = scmp.lt.s32.totalorder %s2771_s26, %s2764_s12 }
  0x62   : > { %p2767_p11 = pnand %p2765_p10, %p3218_p8 }
  0x63   : > { %p2774_p2 = por %p2773_p0, %p2772_p13 }
  0x64   : > { %p2768_p12 = pneg %p2767_p11 }
  0x66   : > { %p2775_p5 = pnand %p2774_p2, %p2768_p12 }
  0x68   : > { %2778 = shalt.err (!%p2775_p5)
}
  0x69   : > { %2568 = dma.hbm_to_vmem [thread:$0]  (!%p3202_p6), %s3716_s5, 16, %s353_s28, [#allocation12]  }
  0x6a   : > { %s3086_s1 = smov [#allocation14]   ;;  %s3087_s27 = smov [#allocation7]  }
  0x6b   : > { %s376_s25 = sshll.u32 %s3086_s1, 4  ;;  %s314_s29 = sshll.u32 %s3087_s27, 4  ;;  %s377_s25 = int_to_ptr.vmem [resolvable:$true] %s376_s25  ;;  %s315_s29 = int_to_ptr.vmem [resolvable:$true] %s314_s29 }
  0x6c   : > { %s2779_s10 = scalar_lea.hbm %s3691_s7, 16 }
  0x6d   : > { %p2780_p7 = scmp.ne.s32.totalorder %s3691_s7, %s2779_s10  ;;  %p2786_p1 = scmp.lt.u32.totalorder %s2779_s10, %s3691_s7 }
  0x6f   : > { %p2782_p9 = pnand %p2780_p7, %p3218_p8 }
  0x71   : > { %p2783_p4 = pneg %p2782_p9 }
  0x73   : > { %p2788_p3 = pnand %p2786_p1, %p2783_p4 }
  0x75   : > { %2791 = shalt.err (!%p2788_p3)
}
  0x76   : > { %s2792_s28 = scalar_lea.vmem %s377_s25, 16  ;;  %s2799_s11 = scalar_lea.vmem %s377_s25, 32 }
  0x77   : > { %p2793_p10 = scmp.ne.s32.totalorder %s377_s25, %s2792_s28  ;;  %p2800_p13 = scmp.lt.s32.totalorder %s377_s25, %s377_s25 }
  0x78   : > { %p2801_p0 = scmp.lt.s32.totalorder %s2799_s11, %s2792_s28 }
  0x79   : > { %p2795_p11 = pnand %p2793_p10, %p3218_p8 }
  0x7a   : > { %p2802_p2 = por %p2801_p0, %p2800_p13 }
  0x7b   : > { %p2796_p12 = pneg %p2795_p11 }
  0x7d   : > { %p2803_p5 = pnand %p2802_p2, %p2796_p12 }
  0x7f   : > { %2806 = shalt.err (!%p2803_p5)
}
  0x80   : > { %2574 = dma.hbm_to_vmem [thread:$0]  (!%p3202_p6), %s3691_s7, 16, %s377_s25, [#allocation15]  }
  0x81   : > { %s2807_s30 = scalar_lea.hbm %s3686_s2, 2048 }
  0x82   : > { %p2808_p7 = scmp.ne.s32.totalorder %s3686_s2, %s2807_s30  ;;  %p2814_p1 = scmp.lt.u32.totalorder %s2807_s30, %s3686_s2 }
  0x84   : > { %p2810_p9 = pnand %p2808_p7, %p3218_p8 }
  0x86   : > { %p2811_p4 = pneg %p2810_p9 }
  0x88   : > { %p2816_p3 = pnand %p2814_p1, %p2811_p4 }
  0x8a   : > { %2819 = shalt.err (!%p2816_p3)
}
  0x8b   : > { %s2820_s28 = scalar_lea.vmem %s315_s29, 2048  ;;  %p2828_p13 = scmp.lt.s32.totalorder %s315_s29, %s315_s29 }
  0x8c   : > { %p2821_p10 = scmp.ne.s32.totalorder %s315_s29, %s2820_s28  ;;  %p2829_p0 = scmp.lt.s32.totalorder %s2820_s28, %s2820_s28 }
  0x8e   : > { %p2823_p11 = pnand %p2821_p10, %p3218_p8  ;;  %p2830_p2 = por %p2829_p0, %p2828_p13 }
  0x90   : > { %p2824_p12 = pneg %p2823_p11 }
  0x92   : > { %p2831_p5 = pnand %p2830_p2, %p2824_p12 }
  0x94   : > { %2834 = shalt.err (!%p2831_p5)
}
  0x95   : > { %s3717_s25 = smov 8   ;;  %s3718_s11 = smov 128  }
  0x96   : > { %2559 = dma.hbm_to_vmem [thread:$0]  (!%p3202_p6), %s3686_s2, 2048, %s315_s29, [#allocation6], %s3718_s11, %s3718_s11, %s3717_s25  }
  0x97   : > { %s3088_s10 = smov [#allocation10]   ;;  %s3089_s30 = smov [#allocation13]  }
  0x98   : > { %s341_s16 = sshll.u32 %s3088_s10, 4  ;;  %s362_s23 = sshll.u32 %s3089_s30, 4  ;;  %s342_s16 = int_to_ptr.vmem [resolvable:$true] %s341_s16  ;;  %s363_s23 = int_to_ptr.vmem [resolvable:$true] %s362_s23 }
  0x99   : > { %s2835_s22 = scalar_lea.hbm %s3688_s4, 16 }
  0x9a   : > { %p2836_p7 = scmp.ne.s32.totalorder %s3688_s4, %s2835_s22  ;;  %p2842_p1 = scmp.lt.u32.totalorder %s2835_s22, %s3688_s4 }
  0x9c   : > { %p2838_p9 = pnand %p2836_p7, %p3218_p8 }
  0x9e   : > { %p2839_p4 = pneg %p2838_p9 }
  0xa0   : > { %p2844_p3 = pnand %p2842_p1, %p2839_p4 }
  0xa2   : > { %2847 = shalt.err (!%p2844_p3)
}
  0xa3   : > { %s2848_s29 = scalar_lea.vmem %s342_s16, 16  ;;  %s2855_s27 = scalar_lea.vmem %s342_s16, 32 }
  0xa4   : > { %p2849_p10 = scmp.ne.s32.totalorder %s342_s16, %s2848_s29  ;;  %p2856_p13 = scmp.lt.s32.totalorder %s342_s16, %s342_s16 }
  0xa5   : > { %p2857_p0 = scmp.lt.s32.totalorder %s2855_s27, %s2848_s29 }
  0xa6   : > { %p2851_p11 = pnand %p2849_p10, %p3218_p8 }
  0xa7   : > { %p2858_p2 = por %p2857_p0, %p2856_p13 }
  0xa8   : > { %p2852_p12 = pneg %p2851_p11 }
  0xaa   : > { %p2859_p5 = pnand %p2858_p2, %p2852_p12 }
  0xac   : > { %2862 = shalt.err (!%p2859_p5)
}
  0xad   : > { %2565 = dma.hbm_to_vmem [thread:$0]  (!%p3202_p6), %s3688_s4, 16, %s342_s16, [#allocation9]  }
  0xae   : > { %s2863_s12 = scalar_lea.hbm %s3690_s6, 512 }
  0xaf   : > { %p2864_p7 = scmp.ne.s32.totalorder %s3690_s6, %s2863_s12  ;;  %p2870_p1 = scmp.lt.u32.totalorder %s2863_s12, %s3690_s6 }
  0xb1   : > { %p2866_p9 = pnand %p2864_p7, %p3218_p8 }
  0xb3   : > { %p2867_p4 = pneg %p2866_p9 }
  0xb5   : > { %p2872_p3 = pnand %p2870_p1, %p2867_p4 }
  0xb7   : > { %2875 = shalt.err (!%p2872_p3)
}
  0xb8   : > { %s2876_s29 = scalar_lea.vmem %s363_s23, 512  ;;  %p2884_p13 = scmp.lt.s32.totalorder %s363_s23, %s363_s23 }
  0xb9   : > { %p2877_p10 = scmp.ne.s32.totalorder %s363_s23, %s2876_s29  ;;  %p2885_p0 = scmp.lt.s32.totalorder %s2876_s29, %s2876_s29 }
  0xbb   : > { %p2879_p11 = pnand %p2877_p10, %p3218_p8  ;;  %p2886_p2 = por %p2885_p0, %p2884_p13 }
  0xbd   : > { %p2880_p12 = pneg %p2879_p11 }
  0xbf   : > { %p2887_p5 = pnand %p2886_p2, %p2880_p12 }
  0xc1   : > { %2890 = shalt.err (!%p2887_p5)
}
  0xc2   : > { %2571 = dma.hbm_to_vmem [thread:$0]  (!%p3202_p6), %s3690_s6, 512, %s363_s23, [#allocation12], %s3718_s11, %s3718_s11, %s3717_s25  }
  0xc3   : > { %s3090_s3 = smov [#allocation16]   ;;  %s3091_s5 = smov [#allocation17]  }
  0xc4   : > { %s386_s10 = sshll.u32 %s3090_s3, 4  ;;  %s400_s30 = sshll.u32 %s3091_s5, 4  ;;  %s387_s10 = int_to_ptr.vmem [resolvable:$true] %s386_s10  ;;  %s401_s30 = int_to_ptr.vmem [resolvable:$true] %s400_s30 }
  0xc5   : > { %s2891_s22 = scalar_lea.hbm %s3692_s8, 2048 }
  0xc6   : > { %p2892_p7 = scmp.ne.s32.totalorder %s3692_s8, %s2891_s22  ;;  %p2898_p1 = scmp.lt.u32.totalorder %s2891_s22, %s3692_s8 }
  0xc8   : > { %p2894_p9 = pnand %p2892_p7, %p3218_p8 }
  0xca   : > { %p2895_p4 = pneg %p2894_p9 }
  0xcc   : > { %p2900_p3 = pnand %p2898_p1, %p2895_p4 }
  0xce   : > { %2903 = shalt.err (!%p2900_p3)
}
  0xcf   : > { %s2904_s23 = scalar_lea.vmem %s387_s10, 2048  ;;  %p2912_p13 = scmp.lt.s32.totalorder %s387_s10, %s387_s10 }
  0xd0   : > { %p2905_p10 = scmp.ne.s32.totalorder %s387_s10, %s2904_s23  ;;  %p2913_p0 = scmp.lt.s32.totalorder %s2904_s23, %s2904_s23 }
  0xd2   : > { %p2907_p11 = pnand %p2905_p10, %p3218_p8  ;;  %p2914_p2 = por %p2913_p0, %p2912_p13 }
  0xd4   : > { %p2908_p12 = pneg %p2907_p11 }
  0xd6   : > { %p2915_p5 = pnand %p2914_p2, %p2908_p12 }
  0xd8   : > { %2918 = shalt.err (!%p2915_p5)
}
  0xd9   : > { %2577 = dma.hbm_to_vmem [thread:$0]  (!%p3202_p6), %s3692_s8, 2048, %s387_s10, [#allocation15], %s3718_s11, %s3718_s11, %s3717_s25  }
  0xda   : > { %s2919_s26 = scalar_lea.hbm %s3693_s9, 16 }
  0xdb   : > { %p2920_p7 = scmp.ne.s32.totalorder %s3693_s9, %s2919_s26  ;;  %p2926_p1 = scmp.lt.u32.totalorder %s2919_s26, %s3693_s9 }
  0xdd   : > { %p2922_p9 = pnand %p2920_p7, %p3218_p8 }
  0xdf   : > { %p2923_p4 = pneg %p2922_p9 }
  0xe1   : > { %p2928_p3 = pnand %p2926_p1, %p2923_p4 }
  0xe3   : > { %2931 = shalt.err (!%p2928_p3)
}
  0xe4   : > { %s2932_s16 = scalar_lea.vmem %s401_s30, 16  ;;  %s2939_s25 = scalar_lea.vmem %s401_s30, 32 }
  0xe5   : > { %p2933_p10 = scmp.ne.s32.totalorder %s401_s30, %s2932_s16  ;;  %p2940_p13 = scmp.lt.s32.totalorder %s401_s30, %s401_s30 }
  0xe6   : > { %p2941_p0 = scmp.lt.s32.totalorder %s2939_s25, %s2932_s16 }
  0xe7   : > { %p2935_p11 = pnand %p2933_p10, %p3218_p8 }
  0xe8   : > { %p2942_p2 = por %p2941_p0, %p2940_p13 }
  0xe9   : > { %p2936_p12 = pneg %p2935_p11 }
  0xeb   : > { %p2943_p5 = pnand %p2942_p2, %p2936_p12 }
  0xed   : > { %2946 = shalt.err (!%p2943_p5)
}
  0xee   : > { %2580 = dma.hbm_to_vmem [thread:$0]  (!%p3202_p6), %s3693_s9, 16, %s401_s30, [#allocation18]  }
  0xef   : > { %s2187_s19 = sadd.s32 4294967294, %s3079_s18   ;;  %s43_s23 = sadd.s32 1, %s3075_s17 }
  0xf0   : > { %s50_s24 = sadd.s32 1, %s3067_s15  ;;  %p45_p8 = scmp.ge.s32.totalorder %s43_s23, 2 }
  0xf1   : > { %p57_p7 = scmp.ne.s32.totalorder %s3067_s15, %s3063_s14  ;;  %p58_p9 = scmp.eq.s32.totalorder %s3079_s18, 0 }
  0xf2   : > { %p63_p4 = scmp.ne.s32.totalorder %s3063_s14, %s3059_s13  ;;  %s3739_s23 = smov (%p45_p8, %s43_s23), 0 }
  0xf3   : > { %p3406_p1 = por %p58_p9, %p57_p7  ;;  %p3720_p3 = scmp.ne.s32.totalorder %s3710_s20, 0 }
  0xf4   : > { %s47_s3 = ssub.s32 %s3075_s17, %s3739_s23  ;;  %s3722_s5 = sadd.s32 4294967295, %s3079_s18  }
  0xf5   : > { %p3412_p6 = por %p3720_p3, %p63_p4  ;;  %p278_p10 = scmp.eq.s32.totalorder %s3722_s5, 1 }
  0xf6   : > { %p48_p11 = scmp.eq.s32.totalorder %s47_s3, 0  ;;  %p284_p12 = scmp.eq.s32.totalorder %s2187_s19, 1 }
  0xf7   : > { %p3420_p13 = por %p278_p10, %p57_p7  ;;  %p2598_p0 = scmp.lt.s32.totalorder %s3079_s18, 2 }
  0xf8   : > { %s3426_s26 = scalar_select %p48_p11, %s3067_s15, %s50_s24  }
  0xf9   : > { %s3723_s12 = scalar_select %p3420_p13, 1, 0 }
  0xfa   : > { %p3428_p2 = por %p284_p12, %p63_p4  ;;  %s411_s28 = sand.u32 1, %s3067_s15  }
  0xfb   : > { %s2199_s1 = sshll.u32 %s411_s28, 3  ;;  %s2200_s29 = sshll.u32 %s3075_s17, 7 }
  0xfc   : > { %s3724_s22 = scalar_select %p3428_p2, 1, 0 }
  0xfd   : > { %s3437_s11 = scalar_lea.hbm %s3684_s0, %s2200_s29  ;;  %s415_s10 = scalar_lea.vmem [#allocation2], %s2199_s1 }
  0xfe   : > { %s422_s19 = sshll.u32 %s415_s10, 4  ;;  %p3443_p5 = pnand %p2598_p0, %p3406_p1  ;;  %s3439_s19 = int_to_ptr.vmem [resolvable:$true] %s422_s19 }
  0xff   : > { %s412_s3 = scalar_lea.sflag [#allocation3], %s411_s28  ;;  %s2947_s5 = scalar_lea.hbm %s3437_s11, 128 }
 0x100   : > { %p2948_p8 = scmp.ne.s32.totalorder %s3437_s11, %s2947_s5  ;;  %p2949_p7 = pneg %p3443_p5 }
 0x101   : > { %s2952_s16 = scalar_lea.hbm %s3684_s0, 256  ;;  %p2953_p1 = scmp.lt.u32.totalorder %s3437_s11, %s3684_s0 }
 0x102   : > { %p2950_p9 = pnand %p2949_p7, %p2948_p8  ;;  %p2954_p3 = scmp.lt.u32.totalorder %s2952_s16, %s2947_s5 }
 0x103   : > { %p2956_p11 = scmp.lt.u32.totalorder %s2947_s5, %s3437_s11 }
 0x104   : > { %p2951_p4 = pneg %p2950_p9  ;;  %p2955_p10 = por %p2954_p3, %p2953_p1 }
 0x106   : > { %p2957_p12 = por %p2956_p11, %p2955_p10 }
 0x108   : > { %p2958_p0 = pnand %p2957_p12, %p2951_p4 }
 0x10a   : > { %2961 = shalt.err (!%p2958_p0)
}
 0x10b   : > { %s2962_s28 = scalar_lea.vmem %s3439_s19, 128  ;;  %s3092_s10 = smov [#allocation2]  }
 0x10c   : > { %p2963_p8 = scmp.ne.s32.totalorder %s3439_s19, %s2962_s28  ;;  %s2967_s1 = sshll.u32 %s3092_s10, 4  ;;  %s2968_s1 = int_to_ptr.vmem [resolvable:$false] %s2967_s1 }
 0x10d   : > { %s2969_s29 = scalar_lea.vmem %s2968_s1, 256  ;;  %p2970_p13 = scmp.lt.s32.totalorder %s3439_s19, %s2968_s1 }
 0x10e   : > { %p2965_p9 = pnand %p2963_p8, %p2949_p7  ;;  %p2971_p1 = scmp.lt.s32.totalorder %s2969_s29, %s2962_s28 }
 0x110   : > { %p2966_p2 = pneg %p2965_p9  ;;  %p2972_p3 = por %p2971_p1, %p2970_p13 }
 0x112   : > { %p2973_p10 = pnand %p2972_p3, %p2966_p2 }
 0x114   : > { %2976 = shalt.err (!%p2973_p10)
}
 0x115   : > { %2584 = dma.hbm_to_vmem [thread:$0]  (!%p3443_p5), %s3437_s11, 128, %s3439_s19, %s412_s3  }
 0x116   : > { %p3726_p4 = scmp.ne.s32.totalorder %s3711_s21, 0 }
 0x117   : > { %s3475_s5 = sand.u32 (!%p3726_p4), 1, %s3063_s14  }
 0x118   : > { %431 = sbr.rel (%p3726_p4) target bundleno = 4455 (0x1167), region = 60  ;;  %s2202_s16 = sshll.u32 (!%p3726_p4), %s3475_s5, 3 }
 0x119   : > { %s434_s27 = scalar_lea.sflag (!%p3726_p4), [#allocation3], %s3475_s5  ;;  %s437_s25 = scalar_lea.vmem (!%p3726_p4), [#allocation2], %s2202_s16 }
 0x11f   : > { %3030 = dma.done.wait (%p3412_p6), %s434_s27, 128  }
 0x120   : > { %3032 = vsyncadd (%p3412_p6), %s434_s27, 4294967168  ;;  %p3727_p13 = scmp.ne.s32.totalorder %s3710_s20, 0 }
 0x122   : > { %3034 = dma.done.wait (%p3727_p13), [#allocation6], 2064  }
 0x123   : > { %3036 = vsyncadd (%p3727_p13), [#allocation6], 4294965232 }
 0x124   : > { %3038 = dma.done.wait (%p3727_p13), [#allocation9], 528  }
 0x125   : > { %3040 = vsyncadd (%p3727_p13), [#allocation9], 4294966768 }
 0x126   : > { %3042 = dma.done.wait (%p3727_p13), [#allocation12], 528  }
 0x127   : > { %3044 = vsyncadd (%p3727_p13), [#allocation12], 4294966768 }
 0x128   : > { %3046 = dma.done.wait (%p3727_p13), [#allocation15], 2064  }
 0x129   : > { %3048 = vsyncadd (%p3727_p13), [#allocation15], 4294965232 }
 0x12a   : > { %3050 = dma.done.wait (%p3727_p13), [#allocation18], 16  }
 0x12b   : > { %3052 = vsyncadd (%p3727_p13), [#allocation18], 4294967280  ;;  %v3505_v0 = vld [vmem:[%s437_s25] sm:$0xff]  ;;  %vm513_vm0 = vcmask 261120   ;;  %v529_v3 = vld [vmem:[#allocation7] sm:$0xff]  ;;  %v3093_v6 = vmov 0.0|0.0  }
 0x12c   : > { %v512_v1 = vmul.f32 %v3505_v0, %v3505_v0  ;;  %v530_v4 = vld [vmem:[#allocation7 + $0x8] sm:$0xff]  ;;  %v531_v5 = vld [vmem:[#allocation7 + $0x10] sm:$0xff]  ;;  %2459 = vmatprep.subr.bf16.mxu0 %v3093_v6  ;;  %v532_v8 = vld [vmem:[#allocation7 + $0x18] sm:$0xff]  ;;  %vm3094_vm1 = vmmov 0   ;;  %v3095_v9 = vmov 0.0   ;;  %s3096_s20 = smov 112  }
 0x12d   : > { %v2460_v7 = vpack.c.bf16 %v530_v4, %v529_v3  ;;  %2317 = vmatprep.mubr.msk.f32.mxu0 %vm3094_vm1, %v3095_v9  ;;  %2325 = vmatprep.subr.mxu1 %v3095_v9  ;;  %v2463_v10 = vpack.c.bf16 %v532_v8, %v531_v5  ;;  %v2213_v15 = vld [vmem:[#allocation5] ss:$0 sm:$0xff]  ;;  %s3097_s21 = smov 120   ;;  %vm609_vm2 = vcmask 64512   ;;  %v774_v20 = vld [vmem:[#allocation7 + $0x20] sm:$0xff]  ;;  %v775_v21 = vld [vmem:[#allocation7 + $0x28] sm:$0xff] }
 0x12e   : > { %v514_v2 = vsel %vm513_vm0, %v512_v1, 0.0  ;;  %2327 = vmatprep.mubr.msk.f32.mxu1 %vm3094_vm1, %v3095_v9  ;;  %v2466_v24 = vpack.c.bf16 %v775_v21, %v774_v20  ;;  %v776_v25 = vld [vmem:[#allocation7 + $0x30] sm:$0xff]  ;;  %v777_v26 = vld [vmem:[#allocation7 + $0x38] sm:$0xff]  ;;  %v772_v52 = vld [vmem:[#allocation8] sm:$0xff]  ;;  %s3728_s30 = sld [smem:[#allocation27_spill]]  ;;  %s509_s19 = scalar_lea.vmem [#allocation19], %s2202_s16 }
 0x12f   : > { %515 = vadd.xlane.f32.xlu0 %v514_v2  ;;  %2461 = vmatpush3.bf16.msra.mxu0 %v2460_v7  ;;  %v2469_v27 = vpack.c.bf16 %v777_v26, %v776_v25  ;;  %v1014_v53 = vld [vmem:[#allocation8 + $0x8] sm:$0xff]  ;;  %v1162_v58 = vld [vmem:[#allocation7 + $0x40] sm:$0xff]  ;;  %v1164_v2 = vld [vmem:[#allocation7 + $0x50] sm:$0xff]  ;;  %s2021_s24 = sshll.u32 %s509_s19, 4  ;;  %s3729_s10 = sld [smem:[#allocation31_spill]]  ;;  %s3636_s24 = int_to_ptr.vmem [resolvable:$true] %s2021_s24 }
 0x130   : > { %2462 = vmatprep.subr.bf16.mxu0 %v3093_v6  ;;  %v1163_v59 = vld [vmem:[#allocation7 + $0x48] sm:$0xff]  ;;  %v1165_v3 = vld [vmem:[#allocation7 + $0x58] sm:$0xff]  ;;  %v1402_v26 = vld [vmem:[#allocation8 + $0x10] sm:$0xff]  ;;  %s2007_s29 = scalar_lea.sflag [#allocation4], %s3475_s5  ;;  %s2977_s27 = scalar_lea.vmem %s3636_s24, 128 }
 0x131   : > { %v2472_v62 = vpack.c.bf16 %v1163_v59, %v1162_v58  ;;  %v2475_v4 = vpack.c.bf16 %v1165_v3, %v1164_v2  ;;  %p2978_p6 = scmp.ne.s32.totalorder %s3636_s24, %s2977_s27  ;;  %p3730_p2 = scmp.ne.s32.totalorder %s3723_s12, 0 }
 0x132   : > { %s3098_s16 = smov [#allocation19]  }
 0x133   : > { %2464 = vmatpush3.bf16.msra.mxu0 %v2463_v10  ;;  %p2979_p5 = pnand %p2978_p6, %p3730_p2  ;;  %s2981_s25 = sshll.u32 %s3098_s16, 4  ;;  %s2982_s25 = int_to_ptr.vmem [resolvable:$false] %s2981_s25 }
 0x134   : > { %2320 = vmatprep.subr.mxu0 %v3095_v9  ;;  %s2240_s11 = sshll.u32 %s3728_s30, 7  ;;  %p2984_p11 = scmp.lt.s32.totalorder %s3636_s24, %s2982_s25 }
 0x135   : > { %s3634_s1 = scalar_lea.hbm %s3729_s10, %s2240_s11  ;;  %p2980_p7 = pneg %p2979_p5 }
 0x1bc   : > { %v516_v11 = vpop.xlane.xlu0 %515 }
 0x1bd   : > { %v518_v12 = vmul.f32 0.03125, %v516_v11 }
 0x1bf   : > { %v519_v13 = vadd.f32 1e-05, %v518_v12 }
 0x1c1   : > { %2673 = vrsqrt.f32 %v519_v13 }
 0x1cb   : > { %v2674_v14 = vpop.eup %2673 }
 0x1cc   : > { %v521_v16 = vmul.f32 %v2674_v14, %v3505_v0 }
 0x1ce   : > { %v3519_v17 = vmul.f32 %v2213_v15, %v521_v16 }
 0x1d0   : > { %2318 = vmatmul.mubr.msk.f32.vlgmr.msra.gmra.mrb[0].mxu0 %vm513_vm0, %v3519_v17 }
 0x1d1   : > { %2322 = vmatprep.mubr.msk.f32.mxu0 %vm3094_vm1, %v3095_v9 }
 0x2a3   : > { %v602_v18 = vpop.f32.mrb[0].mxu0 }
 0x2a4   : > { %694 = vrot.lane.b32.xlu1 %v602_v18, %s3096_s20  ;;  %607 = vrot.lane.b32.xlu0 %v602_v18, %s3097_s21  ;;  %v2319_v19 = vpop.f32.mrb[1].mxu0 }
 0x316   : > { %v695_v22 = vpop.permute.xlu1 %694  ;;  %v608_v23 = vpop.permute.xlu0 %607 }
 0x317   : > { %2321 = vmatpush3.xpose.msk.msra.mxu0 %vm609_vm2, %v608_v23  ;;  %2326 = vmatpush3.msra.mxu1 %v695_v22 }
 0x318   : > { %2465 = vmatprep.subr.bf16.mxu0 %v3093_v6  ;;  %2341 = vmatprep.subr.mxu1 %v3095_v9 }
 0x31a   : > { %2323 = vmatmul.mubr.msk.f32.vlgmr.msra.gmra.mrb[2].mxu0 %vm609_vm2, %v602_v18 }
 0x31b   : > { %2467 = vmatpush3.bf16.msra.mxu0 %v2466_v24  ;;  %2338 = vmatprep.mubr.msk.f32.mxu0 %vm3094_vm1, %v3095_v9 }
 0x31c   : > { %2468 = vmatprep.subr.bf16.mxu0 %v3093_v6 }
 0x31f   : > { %2470 = vmatpush3.bf16.msra.mxu0 %v2469_v27 }
 0x320   : > { %2351 = vmatprep.subr.mxu0 %v3095_v9 }
 0x322   : > { %2339 = vmatmul.mubr.msk.f32.vlgmr.msra.gmra.mrb[4].mxu0 %vm513_vm0, %v3519_v17 }
 0x323   : > { %2353 = vmatprep.mubr.msk.f32.mxu0 %vm3094_vm1, %v3095_v9  ;;  %2352 = vmatpush3.msra.mxu0 %v1014_v53  ;;  %v1718_v53 = vld [vmem:[#allocation8 + $0x18] sm:$0xff] }
 0x324   : > { %2471 = vmatprep.subr.bf16.mxu0 %v3093_v6 }
 0x3ed   : > { %v680_v28 = vpop.f32.mrb[2].mxu0 }
 0x3ee   : > { %v684_v29 = vmul.f32 0.35355338, %v680_v28  ;;  %v2324_v30 = vpop.f32.mrb[3].mxu0  ;;  %v1478_v28 = vld [vmem:[#allocation7 + $0x60] sm:$0xff] }
 0x3f0   : > { %v685_v31 = vsel %vm609_vm2, %v684_v29, -inf }
 0x3f1   : > { %686 = vmax.xlane.f32.xlu1 %v685_v31 }
 0x3f5   : > { %v844_v32 = vpop.f32.mrb[4].mxu0 }
 0x3f6   : > { %935 = vrot.lane.b32.xlu0 %v844_v32, %s3096_s20  ;;  %v2340_v33 = vpop.f32.mrb[5].mxu0 }
 0x402   : > { %849 = vrot.lane.b32.xlu1 %v844_v32, %s3097_s21 }
 0x468   : > { %v936_v39 = vpop.permute.xlu0 %935 }
 0x47e   : > { %v687_v34 = vpop.xlane.xlu1 %686 }
 0x47f   : > { %v688_v35 = vsub.f32 %v684_v29, %v687_v34  ;;  %v1479_v29 = vld [vmem:[#allocation7 + $0x68] sm:$0xff] }
 0x481   : > { %v689_v36 = vmul.f32 1.442695, %v688_v35  ;;  %v1480_v35 = vld [vmem:[#allocation7 + $0x70] sm:$0xff] }
 0x482   : > { %v850_v38 = vpop.permute.xlu1 %849 }
 0x483   : > { %2675 = vpow2.f32 %v689_v36  ;;  %v1481_v36 = vld [vmem:[#allocation7 + $0x78] sm:$0xff] }
 0x48d   : > { %v2676_v37 = vpop.eup %2675 }
 0x48e   : > { %2328 = vmatmul.mubr.msk.f32.vlgmr.msra.gmra.mrb[0].mxu1 %vm609_vm2, %v2676_v37  ;;  %v691_v51 = vsel %vm609_vm2, %v2676_v37, 0.0  ;;  %v2481_v37 = vpack.c.bf16 %v1481_v36, %v1480_v35  ;;  %v1923_v36 = vld [vmem:[#allocation16 + $0x60] sm:$0xff] }
 0x48f   : > { %2342 = vmatpush3.xpose.msk.msra.mxu1 %vm609_vm2, %v850_v38  ;;  %2343 = vmatprep.mubr.msk.f32.mxu1 %vm3094_vm1, %v3095_v9 }
 0x490   : > { %2346 = vmatprep.subr.mxu1 %v3095_v9 }
 0x492   : > { %2344 = vmatmul.mubr.msk.f32.vlgmr.msra.gmra.mrb[2].mxu1 %vm609_vm2, %v844_v32  ;;  %v2478_v32 = vpack.c.bf16 %v1479_v29, %v1478_v28  ;;  %v1918_v28 = vld [vmem:[#allocation16 + $0x38] sm:$0xff] }
 0x493   : > { %2347 = vmatpush3.msra.mxu1 %v936_v39  ;;  %2348 = vmatprep.mubr.msk.f32.mxu1 %vm3094_vm1, %v3095_v9 }
 0x494   : > { %2356 = vmatprep.subr.mxu1 %v3095_v9 }
 0x561   : > { %v766_v40 = vpop.f32.mrb[0].mxu1 }
 0x562   : > { %v2329_v41 = vpop.f32.mrb[1].mxu1 }
 0x565   : > { %v921_v42 = vpop.f32.mrb[2].mxu1 }
 0x566   : > { %v925_v43 = vmul.f32 0.35355338, %v921_v42  ;;  %v2345_v44 = vpop.f32.mrb[3].mxu1 }
 0x568   : > { %v926_v45 = vsel %vm609_vm2, %v925_v43, -inf }
 0x569   : > { %927 = vmax.xlane.f32.xlu1 %v926_v45 }
 0x5f6   : > { %v928_v46 = vpop.xlane.xlu1 %927 }
 0x5f7   : > { %v929_v47 = vsub.f32 %v925_v43, %v928_v46 }
 0x5f9   : > { %v930_v48 = vmul.f32 1.442695, %v929_v47 }
 0x5fb   : > { %2677 = vpow2.f32 %v930_v48 }
 0x605   : > { %v2678_v49 = vpop.eup %2677 }
 0x606   : > { %2349 = vmatmul.mubr.msk.f32.vlgmr.msra.gmra.mrb[4].mxu1 %vm609_vm2, %v2678_v49  ;;  %v932_v50 = vsel %vm609_vm2, %v2678_v49, 0.0 }
 0x607   : > { %933 = vadd.xlane.f32.xlu0 %v932_v50  ;;  %2358 = vmatprep.mubr.msk.f32.mxu1 %vm3094_vm1, %v3095_v9 }
 0x608   : > { %2357 = vmatpush3.msra.mxu1 %v772_v52 }
 0x609   : > { %2372 = vmatprep.subr.mxu1 %v3095_v9 }
 0x60b   : > { %692 = vadd.xlane.f32.xlu0 %v691_v51 }
 0x694   : > { %v934_v54 = vpop.xlane.xlu0 %933 }
 0x698   : > { %v693_v55 = vpop.xlane.xlu0 %692 }
 0x699   : > { %2679 = vrcp.f32 %v693_v55 }
 0x69a   : > { %2681 = vrcp.f32 %v934_v54 }
 0x6a3   : > { %v2680_v56 = vpop.eup %2679 }
 0x6a4   : > { %v771_v57 = vmul.f32 %v2680_v56, %v766_v40  ;;  %v2682_v60 = vpop.eup %2681 }
 0x6a6   : > { %2359 = vmatmul.mubr.msk.f32.vlgmr.msra.gmra.mrb[6].mxu1 %vm609_vm2, %v771_v57 }
 0x6a7   : > { %2374 = vmatprep.mubr.msk.f32.mxu1 %vm3094_vm1, %v3095_v9 }
 0x6d9   : > { %v1007_v61 = vpop.f32.mrb[4].mxu1 }
 0x6da   : > { %v1012_v63 = vmul.f32 %v2682_v60, %v1007_v61  ;;  %v2350_v1 = vpop.f32.mrb[5].mxu1  ;;  %v2234_v60 = vld [vmem:[#allocation10] ss:$0 sm:$0xff] }
 0x6dc   : > { %2354 = vmatmul.mubr.msk.f32.vlgmr.msra.gmra.mrb[6].mxu0 %vm609_vm2, %v1012_v63 }
 0x6dd   : > { %2473 = vmatpush3.bf16.msra.mxu0 %v2472_v62  ;;  %2369 = vmatprep.mubr.msk.f32.mxu0 %vm3094_vm1, %v3095_v9 }
 0x6de   : > { %2474 = vmatprep.subr.bf16.mxu0 %v3093_v6 }
 0x6e1   : > { %2476 = vmatpush3.bf16.msra.mxu0 %v2475_v4  ;;  %v1818_v4 = vld [vmem:[#allocation13] sm:$0xff] }
 0x6e2   : > { %2382 = vmatprep.subr.mxu0 %v3095_v9 }
 0x6e4   : > { %2370 = vmatmul.mubr.msk.f32.vlgmr.msra.gmra.mrb[8].mxu0 %vm513_vm0, %v3519_v17 }
 0x6e5   : > { %2384 = vmatprep.mubr.msk.f32.mxu0 %vm3094_vm1, %v3095_v9  ;;  %2383 = vmatpush3.msra.mxu0 %v1402_v26 }
 0x6e6   : > { %2477 = vmatprep.subr.bf16.mxu0 %v3093_v6 }
 0x779   : > { %v1157_v5 = vpop.f32.mrb[6].mxu1 }
 0x77a   : > { %v2360_v7 = vpop.f32.mrb[7].mxu1 }
 0x7af   : > { %v1084_v8 = vpop.f32.mrb[6].mxu0 }
 0x7b0   : > { %v1158_v10 = vadd.f32 %v1157_v5, %v1084_v8  ;;  %v2355_v11 = vpop.f32.mrb[7].mxu0  ;;  %v1819_v5 = vld [vmem:[#allocation13 + $0x8] sm:$0xff]  ;;  %v1821_v8 = vld [vmem:[#allocation13 + $0x18] sm:$0xff] }
 0x7b1   : > { %v2484_v7 = vpack.c.bf16 %v1819_v5, %v1818_v4  ;;  %v1911_v11 = vld [vmem:[#allocation16] sm:$0xff] }
 0x7b7   : > { %v1232_v12 = vpop.f32.mrb[8].mxu0 }
 0x7b8   : > { %1237 = vrot.lane.b32.xlu1 %v1232_v12, %s3097_s21  ;;  %v2371_v13 = vpop.f32.mrb[9].mxu0 }
 0x82a   : > { %v1238_v14 = vpop.permute.xlu1 %1237 }
 0x82b   : > { %2373 = vmatpush3.xpose.msk.msra.mxu1 %vm609_vm2, %v1238_v14 }
 0x82c   : > { %2377 = vmatprep.subr.mxu1 %v3095_v9 }
 0x82e   : > { %2375 = vmatmul.mubr.msk.f32.vlgmr.msra.gmra.mrb[8].mxu1 %vm609_vm2, %v1232_v12 }
 0x82f   : > { %2379 = vmatprep.mubr.msk.f32.mxu1 %vm3094_vm1, %v3095_v9 }
 0x901   : > { %v1309_v15 = vpop.f32.mrb[8].mxu1 }
 0x902   : > { %v1313_v16 = vmul.f32 0.35355338, %v1309_v15  ;;  %v2376_v18 = vpop.f32.mrb[9].mxu1 }
 0x903   : > { %v2235_v18 = vld [vmem:[#allocation11] ss:$0 sm:$0xff] }
 0x904   : > { %v1314_v19 = vsel %vm609_vm2, %v1313_v16, -inf }
 0x905   : > { %1315 = vmax.xlane.f32.xlu0 %v1314_v19 }
 0x91b   : > { %1323 = vrot.lane.b32.xlu0 %v1232_v12, %s3096_s20  ;;  %v1912_v12 = vld [vmem:[#allocation16 + $0x8] sm:$0xff] }
 0x992   : > { %v1316_v20 = vpop.xlane.xlu0 %1315 }
 0x993   : > { %v1317_v21 = vsub.f32 %v1313_v16, %v1316_v20 }
 0x995   : > { %v1318_v22 = vmul.f32 1.442695, %v1317_v21  ;;  %v1913_v21 = vld [vmem:[#allocation16 + $0x10] sm:$0xff] }
 0x996   : > { %v1324_v23 = vpop.permute.xlu0 %1323 }
 0x997   : > { %2683 = vpow2.f32 %v1318_v22  ;;  %2378 = vmatpush3.msra.mxu1 %v1324_v23  ;;  %v1914_v22 = vld [vmem:[#allocation16 + $0x18] sm:$0xff] }
 0x998   : > { %2408 = vmatprep.subr.mxu1 %v3095_v9  ;;  %v2493_v23 = vpack.c.bf16 %v1914_v22, %v1913_v21 }
 0x9a1   : > { %v2684_v24 = vpop.eup %2683 }
 0x9a2   : > { %2380 = vmatmul.mubr.msk.f32.vlgmr.msra.gmra.mrb[10].mxu1 %vm609_vm2, %v2684_v24  ;;  %v1320_v25 = vsel %vm609_vm2, %v2684_v24, 0.0  ;;  %v1915_v24 = vld [vmem:[#allocation16 + $0x20] sm:$0xff] }
 0x9a3   : > { %1321 = vadd.xlane.f32.xlu1 %v1320_v25  ;;  %2410 = vmatprep.mubr.msk.f32.mxu1 %vm3094_vm1, %v3095_v9  ;;  %v1916_v25 = vld [vmem:[#allocation16 + $0x28] sm:$0xff] }
 0x9a4   : > { %2409 = vmatpush3.msra.mxu1 %v1718_v53  ;;  %v2496_v26 = vpack.c.bf16 %v1916_v25, %v1915_v24 }
 0x9a5   : > { %2489 = vmatprep.subr.bf16.mxu1 %v3093_v6 }
 0xa30   : > { %v1322_v27 = vpop.xlane.xlu1 %1321 }
 0xa31   : > { %2685 = vrcp.f32 %v1322_v27  ;;  %v1917_v27 = vld [vmem:[#allocation16 + $0x30] sm:$0xff] }
 0xa32   : > { %v2499_v29 = vpack.c.bf16 %v1918_v28, %v1917_v27 }
 0xa3b   : > { %v2686_v30 = vpop.eup %2685 }
 0xa75   : > { %v1395_v31 = vpop.f32.mrb[10].mxu1 }
 0xa76   : > { %v1400_v33 = vmul.f32 %v2686_v30, %v1395_v31  ;;  %v2381_v34 = vpop.f32.mrb[11].mxu1  ;;  %v1919_v30 = vld [vmem:[#allocation16 + $0x40] sm:$0xff]  ;;  %v1920_v31 = vld [vmem:[#allocation16 + $0x48] sm:$0xff] }
 0xa77   : > { %v1922_v34 = vld [vmem:[#allocation16 + $0x58] sm:$0xff] }
 0xa78   : > { %2385 = vmatmul.mubr.msk.f32.vlgmr.msra.gmra.mrb[10].mxu0 %vm609_vm2, %v1400_v33  ;;  %v1921_v33 = vld [vmem:[#allocation16 + $0x50] sm:$0xff] }
 0xa79   : > { %2479 = vmatpush3.bf16.msra.mxu0 %v2478_v32  ;;  %2395 = vmatprep.mubr.msk.f32.mxu0 %vm3094_vm1, %v3095_v9  ;;  %v2502_v32 = vpack.c.bf16 %v1920_v31, %v1919_v30  ;;  %v2505_v35 = vpack.c.bf16 %v1922_v34, %v1921_v33 }
 0xa7a   : > { %2480 = vmatprep.subr.bf16.mxu0 %v3093_v6 }
 0xa7d   : > { %2482 = vmatpush3.bf16.msra.mxu0 %v2481_v37  ;;  %v1924_v37 = vld [vmem:[#allocation16 + $0x68] sm:$0xff] }
 0xa7e   : > { %2398 = vmatprep.subr.mxu0 %v3095_v9 }
 0xa80   : > { %2396 = vmatmul.mubr.msk.f32.vlgmr.msra.gmra.mrb[12].mxu0 %vm513_vm0, %v3519_v17 }
 0xa81   : > { %2400 = vmatprep.mubr.msk.f32.mxu0 %vm3094_vm1, %v3095_v9 }
 0xb4b   : > { %v1472_v38 = vpop.f32.mrb[10].mxu0 }
 0xb4c   : > { %v1476_v39 = vadd.f32 %v1472_v38, %v1158_v10  ;;  %v2386_v40 = vpop.f32.mrb[11].mxu0  ;;  %v2508_v38 = vpack.c.bf16 %v1924_v37, %v1923_v36 }
 0xb4d   : > { %v1926_v40 = vld [vmem:[#allocation16 + $0x78] sm:$0xff] }
 0xb53   : > { %v1548_v41 = vpop.f32.mrb[12].mxu0 }
 0xb54   : > { %1639 = vrot.lane.b32.xlu1 %v1548_v41, %s3096_s20  ;;  %1553 = vrot.lane.b32.xlu0 %v1548_v41, %s3097_s21  ;;  %v2397_v42 = vpop.f32.mrb[13].mxu0  ;;  %s2983_s20 = scalar_lea.vmem %s2982_s25, 256 }
 0xb55   : > { %v2236_v42 = vld [vmem:[#allocation14] ss:$0 sm:$0xff]  ;;  %p2985_p12 = scmp.lt.s32.totalorder %s2983_s20, %s2977_s27 }
 0xb57   : > { %p2986_p0 = por %p2985_p12, %p2984_p11 }
 0xb59   : > { %p2987_p8 = pnand %p2986_p0, %p2980_p7 }
 0xbc6   : > { %v1554_v43 = vpop.permute.xlu0 %1553  ;;  %v1640_v44 = vpop.permute.xlu1 %1639 }
 0xbc7   : > { %2399 = vmatpush3.xpose.msk.msra.mxu0 %vm609_vm2, %v1554_v43 }
 0xbc8   : > { %2403 = vmatprep.subr.mxu0 %v3095_v9 }
 0xbca   : > { %2401 = vmatmul.mubr.msk.f32.vlgmr.msra.gmra.mrb[14].mxu0 %vm609_vm2, %v1548_v41 }
 0xbcb   : > { %2404 = vmatpush3.msra.mxu0 %v1640_v44  ;;  %2405 = vmatprep.mubr.msk.f32.mxu0 %vm3094_vm1, %v3095_v9 }
 0xbcc   : > { %2483 = vmatprep.subr.bf16.mxu0 %v3093_v6 }
 0xc9d   : > { %v1625_v17 = vpop.f32.mrb[14].mxu0 }
 0xc9e   : > { %v1629_v45 = vmul.f32 0.35355338, %v1625_v17  ;;  %v2402_v46 = vpop.f32.mrb[15].mxu0 }
 0xca0   : > { %v1630_v47 = vsel %vm609_vm2, %v1629_v45, -inf }
 0xca1   : > { %1631 = vmax.xlane.f32.xlu0 %v1630_v47 }
 0xd2e   : > { %v1632_v48 = vpop.xlane.xlu0 %1631 }
 0xd2f   : > { %v1633_v49 = vsub.f32 %v1629_v45, %v1632_v48 }
 0xd31   : > { %v1634_v50 = vmul.f32 1.442695, %v1633_v49 }
 0xd33   : > { %2687 = vpow2.f32 %v1634_v50 }
 0xd3d   : > { %v2688_v51 = vpop.eup %2687 }
 0xd3e   : > { %2406 = vmatmul.mubr.msk.f32.vlgmr.msra.gmra.mrb[16].mxu0 %vm609_vm2, %v2688_v51  ;;  %v1636_v52 = vsel %vm609_vm2, %v2688_v51, 0.0 }
 0xd3f   : > { %1637 = vadd.xlane.f32.xlu0 %v1636_v52  ;;  %2421 = vmatprep.mubr.msk.f32.mxu0 %vm3094_vm1, %v3095_v9 }
 0xd40   : > { %2485 = vmatpush3.bf16.msra.mxu0 %v2484_v7 }
 0xd41   : > { %2486 = vmatprep.subr.bf16.mxu0 %v3093_v6 }
 0xdcc   : > { %v1638_v54 = vpop.xlane.xlu0 %1637 }
 0xdcd   : > { %2689 = vrcp.f32 %v1638_v54 }
 0xdd7   : > { %v2690_v55 = vpop.eup %2689 }
 0xe11   : > { %v1711_v56 = vpop.f32.mrb[16].mxu0 }
 0xe12   : > { %v1716_v57 = vmul.f32 %v2690_v55, %v1711_v56  ;;  %v2407_v58 = vpop.f32.mrb[17].mxu0 }
 0xe14   : > { %2411 = vmatmul.mubr.msk.f32.vlgmr.msra.gmra.mrb[12].mxu1 %vm609_vm2, %v1716_v57 }
 0xe15   : > { %2456 = vmatprep.mubr.msk.f32.mxu1 %vm3094_vm1, %v3095_v9  ;;  %v1820_v9 = vld [vmem:[#allocation13 + $0x10] sm:$0xff] }
 0xe16   : > { %v2487_v10 = vpack.c.bf16 %v1821_v8, %v1820_v9 }
 0xe18   : > { %2488 = vmatpush3.bf16.msra.mxu0 %v2487_v10 }
 0xee7   : > { %v1788_v59 = vpop.f32.mrb[12].mxu1 }
 0xee8   : > { %v1792_v61 = vadd.f32 %v1788_v59, %v1476_v39  ;;  %v2412_v62 = vpop.f32.mrb[13].mxu1  ;;  %v1925_v39 = vld [vmem:[#allocation16 + $0x70] sm:$0xff] }
 0xee9   : > { %v2511_v41 = vpack.c.bf16 %v1926_v40, %v1925_v39 }
 0xeea   : > { %v1800_v63 = vadd.f32 %v2234_v60, %v1792_v61 }
 0xeec   : > { %v3612_v1 = vadd.f32 %v1800_v63, %v3505_v0  ;;  %v2490_v0 = vpack.c.bf16 %v1912_v12, %v1911_v11 }
 0xeee   : > { %v1803_v2 = vmul.f32 %v3612_v1, %v3612_v1  ;;  %2491 = vmatpush3.bf16.msra.mxu1 %v2490_v0 }
 0xeef   : > { %2492 = vmatprep.subr.bf16.mxu1 %v3093_v6 }
 0xef0   : > { %v1804_v3 = vsel %vm513_vm0, %v1803_v2, 0.0 }
 0xef1   : > { %1805 = vadd.xlane.f32.xlu0 %v1804_v3 }
 0xef2   : > { %2494 = vmatpush3.bf16.msra.mxu1 %v2493_v23 }
 0xef3   : > { %2495 = vmatprep.subr.bf16.mxu1 %v3093_v6 }
 0xef6   : > { %2497 = vmatpush3.bf16.msra.mxu1 %v2496_v26 }
 0xef7   : > { %2498 = vmatprep.subr.bf16.mxu1 %v3093_v6 }
 0xefa   : > { %2500 = vmatpush3.bf16.msra.mxu1 %v2499_v29 }
 0xefb   : > { %2501 = vmatprep.subr.bf16.mxu1 %v3093_v6 }
 0xefe   : > { %2503 = vmatpush3.bf16.msra.mxu1 %v2502_v32 }
 0xeff   : > { %2504 = vmatprep.subr.bf16.mxu1 %v3093_v6 }
 0xf02   : > { %2506 = vmatpush3.bf16.msra.mxu1 %v2505_v35 }
 0xf03   : > { %2507 = vmatprep.subr.bf16.mxu1 %v3093_v6 }
 0xf06   : > { %2509 = vmatpush3.bf16.msra.mxu1 %v2508_v38 }
 0xf07   : > { %2510 = vmatprep.subr.bf16.mxu1 %v3093_v6  ;;  %v2238_v6 = vld [vmem:[#allocation17] ss:$0 sm:$0xff] }
 0xf0a   : > { %2512 = vmatpush3.bf16.msra.mxu1 %v2511_v41 }
 0xf7e   : > { %v1806_v13 = vpop.xlane.xlu0 %1805 }
 0xf7f   : > { %v1807_v14 = vmul.f32 0.03125, %v1806_v13 }
 0xf81   : > { %v1808_v15 = vadd.f32 1e-05, %v1807_v14 }
 0xf83   : > { %2691 = vrsqrt.f32 %v1808_v15 }
 0xf8d   : > { %v2692_v16 = vpop.eup %2691 }
 0xf8e   : > { %v1810_v19 = vmul.f32 %v2692_v16, %v3612_v1 }
 0xf90   : > { %v1817_v20 = vmul.f32 %v2235_v18, %v1810_v19 }
 0xf92   : > { %2422 = vmatmul.mubr.msk.f32.vlgmr.msra.gmra.mrb[18].mxu0 %vm513_vm0, %v1817_v20 }
0x1065   : > { %v1898_v43 = vpop.f32.mrb[18].mxu0 }
0x1066   : > { %v1899_v44 = vadd.f32 %v2236_v42, %v1898_v43  ;;  %v2423_v17 = vpop.f32.mrb[19].mxu0 }
0x1068   : > { %v1903_v45 = vmul.f32 0.44715, %v1899_v44  ;;  %v1902_v51 = vmul.f32 0.5, %v1899_v44 }
0x106a   : > { %v1904_v46 = vmul.f32 %v1903_v45, %v1899_v44 }
0x106c   : > { %v1905_v47 = vmul.f32 %v1904_v46, %v1899_v44 }
0x106e   : > { %v1906_v48 = vadd.f32 %v1905_v47, %v1899_v44 }
0x1070   : > { %v1907_v49 = vmul.f32 0.7978845, %v1906_v48 }
0x1072   : > { %2693 = vtanh.f32 %v1907_v49 }
0x107c   : > { %v2694_v50 = vpop.eup %2693 }
0x107d   : > { %v1909_v52 = vadd.f32 1.0, %v2694_v50 }
0x107f   : > { %v1910_v53 = vmul.f32 %v1909_v52, %v1902_v51 }
0x1081   : > { %2457 = vmatmul.mubr.f32.vlgmr.msra.gmra.mrb[14].mxu1 %v1910_v53 }
0x1154   : > { %v2000_v54 = vpop.f32.mrb[14].mxu1 }
0x1155   : > { %v2001_v55 = vadd.f32 %v2238_v6, %v2000_v54  ;;  %v2458_v56 = vpop.f32.mrb[15].mxu1 }
0x1157   : > { %v2004_v57 = vadd.f32 %v2001_v55, %v3612_v1 }
0x1159   : > { %2005 = vst.msk [vmem:[%s509_s19] sm:$0xff] %vm513_vm0, %v2004_v57 }
0x115a   : > { %2990 = shalt.err (!%p2987_p8)
}
0x115b   : > { %s2991_s5 = scalar_lea.hbm %s3634_s1, 128  ;;  %s2995_s11 = scalar_lea.hbm %s3729_s10, 256 }
0x115c   : > { %p2992_p9 = scmp.ne.s32.totalorder %s3634_s1, %s2991_s5  ;;  %p2996_p10 = scmp.lt.u32.totalorder %s3634_s1, %s3729_s10 }
0x115d   : > { %p2997_p4 = scmp.lt.u32.totalorder %s2995_s11, %s2991_s5  ;;  %p2999_p6 = scmp.lt.u32.totalorder %s2991_s5, %s3634_s1 }
0x115e   : > { %p2993_p1 = pnand %p2992_p9, %p3730_p2 }
0x115f   : > { %p2998_p13 = por %p2997_p4, %p2996_p10 }
0x1160   : > { %p2994_p3 = pneg %p2993_p1 }
0x1161   : > { %p3000_p5 = por %p2999_p6, %p2998_p13 }
0x1163   : > { %p3001_p7 = pnand %p3000_p5, %p2994_p3 }
0x1165   : > { %3004 = shalt.err (!%p3001_p7)
}
0x1166   : > { %2551 = dma.vmem_to_hbm [thread:$0]  (%p3730_p2), %s3636_s24, 128, %s3634_s1, %s2007_s29  }
0x1167 PF: > { %s2033_s28 = sand.u32 1, %s3059_s13   ;;  %p3731_p11 = scmp.ne.s32.totalorder %s3724_s22, 0 }
0x1168   : > { %p3732_p12 = scmp.ge.s32.totalorder %s3079_s18, 2  ;;  %s2034_s27 = scalar_lea.sflag [#allocation4], %s2033_s28 }
0x116a   : > { %p2586_p0 = pnand %p3732_p12, %p3731_p11 }
0x116c   : > { %3054 = dma.done.wait (!%p2586_p0), %s2034_s27, 128  }
0x116d   : > { %3056 = vsyncadd (!%p2586_p0), %s2034_s27, 4294967168  ;;  %s31_s18 = sadd.s32 1, %s3079_s18   ;;  %s3733_s13 = smov %s3063_s14 }
0x116e   : > { %p28_p8 = scmp.ge.s32.totalorder %s31_s18, 4   ;;  %s3734_s14 = smov %s3067_s15 }
0x116f   : > { %s3735_s15 = smov %s3426_s26  ;;  %s3736_s16 = smov %s3075_s17 }
0x1170   : > { %s3737_s17 = smov %s3739_s23  ;;  %30 = sbr.rel (!%p28_p8) target bundleno = 16 (0x10), region = 147 }
0x1177   :  { %2039 = vsyncpa [#allocation3], 1 }
0x1178   :  { %2041 = vsyncpa [#allocation3 + $0x1], 1 }
0x1179   :  { %2042 = vsyncpa [#allocation6], 1 }
0x117a   :  { %2043 = vsyncpa [#allocation9], 1 }
0x117b   :  { %2044 = vsyncpa [#allocation12], 1 }
0x117c   :  { %2045 = vsyncpa [#allocation15], 1 }
0x117d   :  { %2046 = vsyncpa [#allocation18], 1 }
0x117e   :  { %2047 = vsyncpa [#allocation4], 1 }
0x117f   :  { %2049 = vsyncpa [#allocation4 + $0x1], 1 }

</bundles_post_ra>
